<compile_context>
chip_gen: v5e
topology: v5e:2x2
jax: 0.10.0
libtpu: 0.0.40
codegen_flags: <defaults>
</compile_context>

<pallas_src>
import jax
import jax.numpy as jnp
from jax import lax
from jax.experimental import pallas as pl
from jax.experimental.pallas import tpu as pltpu

HIDDEN = 8
OUT = 4
LANE = 128
H4 = 4 * HIDDEN

# Packed weight-slab column offsets (rows = 4H = 32).
_C_WHH1 = 0                       # (4H, H)  lstm1 W_hh
_C_W2 = _C_WHH1 + HIDDEN          # (4H, 2H) [lstm2 W_ih | lstm2 W_hh]
_C_WIH1 = _C_W2 + 2 * HIDDEN      # (4H, 1)  lstm1 W_ih (input size 1)
_C_B1 = _C_WIH1 + 1               # (4H, 1)  lstm1 b_ih + b_hh
_C_B2 = _C_B1 + 1                 # (4H, 1)  lstm2 b_ih + b_hh
_C_WFC = _C_B2 + 1                # (OUT, H) in rows 0:OUT
_C_BFC = _C_WFC + HIDDEN          # (OUT, 1) in rows 0:OUT
W_COLS = _C_BFC + 1               # = 36


def _crime_lstm_kernel(x_ref,      # (T, 1, B)       f32  time-major, batch on lanes
                       w_ref,      # (4H, W_COLS)    f32  packed weights (1 DMA)
                       out_ref,    # (OUT, B)        f32
                       xproj_ref): # (T, 4H, B)      f32  VMEM scratch
    H = HIDDEN
    T = x_ref.shape[0]
    B = x_ref.shape[2]

    w = w_ref[...]
    whh1 = w[:, _C_WHH1:_C_WHH1 + H]           # (4H, H)
    w2 = w[:, _C_W2:_C_W2 + 2 * H]             # (4H, 2H)  fused layer-2 weights
    wih1 = w[:, _C_WIH1:_C_WIH1 + 1]           # (4H, 1)
    b1 = w[:, _C_B1:_C_B1 + 1]                 # (4H, 1)
    b2 = w[:, _C_B2:_C_B2 + 1]                 # (4H, 1)
    wfc = w[:OUT, _C_WFC:_C_WFC + H]           # (OUT, H)
    bfc = w[:OUT, _C_BFC:_C_BFC + 1]           # (OUT, 1)

    # --- prologue: layer-1 input projection + bias, hoisted out of the
    # recurrent loop (fully parallel over T on the VPU).
    # TODO(synk): for very long T, chunk this prologue to bound VMEM.
    xproj_ref[...] = x_ref[...] * wih1[None, :, :] + b1[None, :, :]

    # Hoisted broadcast (JAX does not CSE broadcast_in_dim inside loops).
    b2_b = jnp.broadcast_to(b2, (4 * H, B))

    def cell(gates, c):
        # gates: (4H, B); PyTorch gate order i, f, g, o on the sublane axis,
        # each gate an aligned 8-sublane slice.
        s = jax.nn.sigmoid(gates)              # one full-width EUP pass
        i = s[0 * H:1 * H, :]
        f = s[1 * H:2 * H, :]
        o = s[3 * H:4 * H, :]
        g = jnp.tanh(gates[2 * H:3 * H, :])
        c_new = f * c + i * g
        return o * jnp.tanh(c_new), c_new

    def step(t, carry):
        h1, c1, h2, c2 = carry
        # layer 1: single MXU issue per step (input projection precomputed)
        g1 = xproj_ref[t] + jnp.dot(whh1, h1, preferred_element_type=jnp.float32)
        h1, c1 = cell(g1, c1)
        # layer 2: fused single MXU issue
        h12 = jnp.concatenate([h1, h2], axis=0)                  # (2H, B)
        g2 = jnp.dot(w2, h12, preferred_element_type=jnp.float32) + b2_b
        h2, c2 = cell(g2, c2)
        return h1, c1, h2, c2

    z = jnp.zeros((H, B), jnp.float32)
    carry = (z, z, z, z)
    if T <= 64:
        # Full static unroll (T is a trace-time constant): cross-timestep
        # MXU / EUP / VPU work can overlap; indices into the scratch are static.
        for t in range(T):
            carry = step(t, carry)
    else:
        carry = lax.fori_loop(0, T, step, carry)
    h2 = carry[2]

    # lstm2 output at the last timestep == final hidden state h2.
    # fc in the transposed layout; wrapper transposes (OUT, B) -> (B, OUT).
    out_ref[...] = jnp.dot(wfc, h2, preferred_element_type=jnp.float32) + bfc


def _pack_params(p):
    """Pack all PyTorch-layout parameters into one (4H, W_COLS) slab."""
    H = HIDDEN
    pad_rows = H4 - OUT
    wfc_pad = jnp.concatenate(
        [p["fc_w"], jnp.zeros((pad_rows, H), jnp.float32)], axis=0)          # (4H, H)
    bfc_pad = jnp.concatenate(
        [p["fc_b"][:, None], jnp.zeros((pad_rows, 1), jnp.float32)], axis=0)  # (4H, 1)
    return jnp.concatenate(
        [
            p["w_hh_l0"],                                        # cols 0:8
            jnp.concatenate([p["w_ih_l1"], p["w_hh_l1"]], axis=1),  # cols 8:24
            p["w_ih_l0"],                                        # col 24
            (p["b_ih_l0"] + p["b_hh_l0"])[:, None],              # col 25
            (p["b_ih_l1"] + p["b_hh_l1"])[:, None],              # col 26
            wfc_pad,                                             # cols 27:35
            bfc_pad,                                             # col 35
        ],
        axis=1,
    ).astype(jnp.float32)                                        # (32, 36)


@jax.jit
def crime_model_lstm(x, params):
    """x: (B, T, 1) float32 (PyTorch batch_first). Returns (B, 4) float32.

    Dropout(0.2) is eval-mode identity.
    """
    B, T, F = x.shape
    assert F == 1, "CrimeModelLSTM input feature size is 1"
    w_slab = _pack_params(params)                 # (4H, W_COLS), single DMA

    # Transposed layout: time-major, singleton feature row, batch on lanes.
    x_t1b = jnp.transpose(x, (1, 2, 0))           # (T, 1, B)

    # Batch tiling: 128-lane tiles when B is large (streams + shards across
    # TensorCores on v7x), otherwise one program with the whole batch.
    if B > LANE:
        tile_b = LANE
        b_pad = pl.cdiv(B, LANE) * LANE
    else:
        tile_b = B
        b_pad = B
    if b_pad != B:
        x_t1b = jnp.pad(x_t1b, ((0, 0), (0, 0), (0, b_pad - B)))
    grid_b = b_pad // tile_b

    out = pl.pallas_call(
        _crime_lstm_kernel,
        out_shape=jax.ShapeDtypeStruct((OUT, b_pad), jnp.float32),
        grid_spec=pltpu.PrefetchScalarGridSpec(
            num_scalar_prefetch=0,
            grid=(grid_b,),
            in_specs=[
                pl.BlockSpec((T, 1, tile_b), lambda b: (0, 0, b)),
                pl.BlockSpec((H4, W_COLS), lambda b: (0, 0)),
            ],
            out_specs=pl.BlockSpec((OUT, tile_b), lambda b: (0, b)),
            scratch_shapes=[pltpu.VMEM((T, H4, tile_b), jnp.float32)],
        ),
        compiler_params=pltpu.CompilerParams(
            dimension_semantics=("parallel",)),
    )(x_t1b, w_slab)

    # Drop padded batch lanes (never returned) and restore (B, OUT).
    return out[:, :B].T


def init_params(key):
    """Deterministic init with native PyTorch parameter shapes."""
    H = HIDDEN
    ks = jax.random.split(key, 10)
    bound = 1.0 / jnp.sqrt(H)
    u = lambda k, shape: jax.random.uniform(k, shape, jnp.float32, -bound, bound)
    return dict(
        w_ih_l0=u(ks[0], (4 * H, 1)),
        w_hh_l0=u(ks[1], (4 * H, H)),
        b_ih_l0=u(ks[2], (4 * H,)),
        b_hh_l0=u(ks[3], (4 * H,)),
        w_ih_l1=u(ks[4], (4 * H, H)),
        w_hh_l1=u(ks[5], (4 * H, H)),
        b_ih_l1=u(ks[6], (4 * H,)),
        b_hh_l1=u(ks[7], (4 * H,)),
        fc_w=u(ks[8], (OUT, H)),
        fc_b=u(ks[9], (OUT,)),
    )


def _reference(x, p):
    """Pure-JAX reference of the same forward pass (PyTorch semantics)."""
    H = HIDDEN
    B = x.shape[0]
    wih1, whh1 = p["w_ih_l0"].T, p["w_hh_l0"].T
    b1 = (p["b_ih_l0"] + p["b_hh_l0"])[None, :]
    wih2, whh2 = p["w_ih_l1"].T, p["w_hh_l1"].T
    b2 = (p["b_ih_l1"] + p["b_hh_l1"])[None, :]

    def cell(gates, c):
        i = jax.nn.sigmoid(gates[:, 0 * H:1 * H])
        f = jax.nn.sigmoid(gates[:, 1 * H:2 * H])
        g = jnp.tanh(gates[:, 2 * H:3 * H])
        o = jax.nn.sigmoid(gates[:, 3 * H:4 * H])
        c_new = f * c + i * g
        return o * jnp.tanh(c_new), c_new

    def step(carry, x_t):
        h1, c1, h2, c2 = carry
        g1 = x_t @ wih1 + h1 @ whh1 + b1
        h1, c1 = cell(g1, c1)
        g2 = h1 @ wih2 + h2 @ whh2 + b2
        h2, c2 = cell(g2, c2)
        return (h1, c1, h2, c2), None

    z = jnp.zeros((B, H), jnp.float32)
    (_, _, h2, _), _ = lax.scan(step, (z, z, z, z), jnp.transpose(x, (1, 0, 2)))
    return h2 @ p["fc_w"].T + p["fc_b"][None, :]


if __name__ == "__main__":
    key = jax.random.PRNGKey(0)
    k_param, k_x, k_x2 = jax.random.split(key, 3)
    params = init_params(k_param)

    # Small shapes consistent with the module: batch=4, seq=8, feature=1.
    B, T = 4, 8
    x = jax.random.normal(k_x, (B, T, 1), jnp.float32)
    out = jax.block_until_ready(crime_model_lstm(x, params))
    ref = _reference(x, params)
    assert out.shape == (B, OUT)
    assert jnp.allclose(out, ref, atol=1e-4, rtol=1e-4), (out, ref)

    # Exercise the batch-tiled / padded grid path (grid=(2,), "parallel" axis).
    B2, T2 = 160, 8
    x2 = jax.random.normal(k_x2, (B2, T2, 1), jnp.float32)
    out2 = jax.block_until_ready(crime_model_lstm(x2, params))
    ref2 = _reference(x2, params)
    assert out2.shape == (B2, OUT)
    assert jnp.allclose(out2, ref2, atol=1e-4, rtol=1e-4)

    print("KERNEL_OK")
</pallas_src>

<mosaic_0001>
module attributes {stable_mosaic.version = 11 : i64} {
  func.func @_crime_lstm_kernel(%arg0: i32, %arg1: memref<8x1x4xf32, #tpu.memory_space<vmem>>, %arg2: memref<32x36xf32, #tpu.memory_space<vmem>>, %arg3: memref<4x4xf32, #tpu.memory_space<vmem>>, %arg4: memref<8x32x4xf32, #tpu.memory_space<vmem>>) attributes {dimension_semantics = [#tpu.dimension_semantics<parallel>], iteration_bounds = array<i64: 1>, scalar_prefetch = 0 : i64, scratch_operands = 1 : i64, tpu.core_type = #tpu.core_type<tc>, window_params = [{transform_indices = @transform_0, window_bounds = array<i64: 8, 1, 4>}, {pipeline_mode = #tpu.pipeline_mode<synchronous>, transform_indices = @transform_1, window_bounds = array<i64: 32, 36>}, {transform_indices = @transform_2, window_bounds = array<i64: 4, 4>}]} {
    %c0 = arith.constant 0 : index
    %c0_0 = arith.constant 0 : index
    %0 = vector.load %arg2[%c0, %c0_0] : memref<32x36xf32, #tpu.memory_space<vmem>>, vector<32x36xf32>
    %1 = vector.extract_strided_slice %0 {offsets = [0, 0], sizes = [32, 8], strides = [1, 1]} : vector<32x36xf32> to vector<32x8xf32>
    %2 = vector.extract_strided_slice %0 {offsets = [0, 8], sizes = [32, 16], strides = [1, 1]} : vector<32x36xf32> to vector<32x16xf32>
    %3 = vector.extract_strided_slice %0 {offsets = [0, 24], sizes = [32, 1], strides = [1, 1]} : vector<32x36xf32> to vector<32x1xf32>
    %4 = vector.extract_strided_slice %0 {offsets = [0, 25], sizes = [32, 1], strides = [1, 1]} : vector<32x36xf32> to vector<32x1xf32>
    %5 = vector.extract_strided_slice %0 {offsets = [0, 26], sizes = [32, 1], strides = [1, 1]} : vector<32x36xf32> to vector<32x1xf32>
    %6 = vector.extract_strided_slice %0 {offsets = [0, 27], sizes = [4, 8], strides = [1, 1]} : vector<32x36xf32> to vector<4x8xf32>
    %7 = vector.extract_strided_slice %0 {offsets = [0, 35], sizes = [4, 1], strides = [1, 1]} : vector<32x36xf32> to vector<4x1xf32>
    %c0_1 = arith.constant 0 : index
    %c0_2 = arith.constant 0 : index
    %c0_3 = arith.constant 0 : index
    %8 = vector.load %arg1[%c0_1, %c0_2, %c0_3] : memref<8x1x4xf32, #tpu.memory_space<vmem>>, vector<8x1x4xf32>
    %9 = vector.shape_cast %3 : vector<32x1xf32> to vector<1x32x1xf32>
    %10 = vector.broadcast %8 : vector<8x1x4xf32> to vector<8x32x4xf32>
    %11 = vector.broadcast %9 : vector<1x32x1xf32> to vector<8x32x4xf32>
    %12 = arith.mulf %10, %11 : vector<8x32x4xf32>
    %13 = vector.shape_cast %4 : vector<32x1xf32> to vector<1x32x1xf32>
    %14 = vector.broadcast %13 : vector<1x32x1xf32> to vector<8x32x4xf32>
    %15 = arith.addf %12, %14 : vector<8x32x4xf32>
    %c0_4 = arith.constant 0 : index
    %c0_5 = arith.constant 0 : index
    %c0_6 = arith.constant 0 : index
    %16 = vector.load %arg4[%c0_4, %c0_5, %c0_6] : memref<8x32x4xf32, #tpu.memory_space<vmem>>, vector<8x32x4xf32>
    tpu.vector_store %arg4[%c0_4, %c0_5, %c0_6], %15 {strides = array<i32>} : memref<8x32x4xf32, #tpu.memory_space<vmem>>, vector<8x32x4xf32>,
    %17 = vector.shape_cast %5 : vector<32x1xf32> to vector<32x1xf32>
    %18 = vector.broadcast %17 : vector<32x1xf32> to vector<32x4xf32>
    %cst = arith.constant 0.000000e+00 : f32
    %19 = vector.broadcast %cst : f32 to vector<8x4xf32>
    %c0_7 = arith.constant 0 : index
    %c0_8 = arith.constant 0 : index
    %c0_9 = arith.constant 0 : index
    %20 = vector.load %arg4[%c0_7, %c0_8, %c0_9] : memref<8x32x4xf32, #tpu.memory_space<vmem>>, vector<1x32x4xf32>
    %21 = vector.shape_cast %20 : vector<1x32x4xf32> to vector<32x4xf32>
    %cst_10 = arith.constant dense<0.000000e+00> : vector<32x4xf32>
    %22 = tpu.matmul %1, %19, %cst_10 {dimension_numbers = #tpu.dot_dimension_numbers<[1], [0], [0], [1], [0, 0, 1, 1], [], []>} : vector<32x8xf32>, vector<8x4xf32>, vector<32x4xf32> -> vector<32x4xf32>
    %23 = arith.addf %21, %22 : vector<32x4xf32>
    %24 = arith.negf %23 : vector<32x4xf32>
    %25 = math.exp %24 : vector<32x4xf32>
    %cst_11 = arith.constant 1.000000e+00 : f32
    %26 = vector.broadcast %cst_11 : f32 to vector<32x4xf32>
    %27 = arith.addf %26, %25 : vector<32x4xf32>
    %28 = arith.divf %26, %27 : vector<32x4xf32>
    %29 = vector.extract_strided_slice %28 {offsets = [0, 0], sizes = [8, 4], strides = [1, 1]} : vector<32x4xf32> to vector<8x4xf32>
    %30 = vector.extract_strided_slice %28 {offsets = [8, 0], sizes = [8, 4], strides = [1, 1]} : vector<32x4xf32> to vector<8x4xf32>
    %31 = vector.extract_strided_slice %28 {offsets = [24, 0], sizes = [8, 4], strides = [1, 1]} : vector<32x4xf32> to vector<8x4xf32>
    %32 = vector.extract_strided_slice %23 {offsets = [16, 0], sizes = [8, 4], strides = [1, 1]} : vector<32x4xf32> to vector<8x4xf32>
    %33 = math.tanh %32 : vector<8x4xf32>
    %34 = arith.mulf %30, %19 : vector<8x4xf32>
    %35 = arith.mulf %29, %33 : vector<8x4xf32>
    %36 = arith.addf %34, %35 : vector<8x4xf32>
    %37 = math.tanh %36 : vector<8x4xf32>
    %38 = arith.mulf %31, %37 : vector<8x4xf32>
    %39 = tpu.concatenate %38, %19 in 0 : vector<8x4xf32>, vector<8x4xf32> -> vector<16x4xf32>
    %cst_12 = arith.constant dense<0.000000e+00> : vector<32x4xf32>
    %40 = tpu.matmul %2, %39, %cst_12 {dimension_numbers = #tpu.dot_dimension_numbers<[1], [0], [0], [1], [0, 0, 1, 1], [], []>} : vector<32x16xf32>, vector<16x4xf32>, vector<32x4xf32> -> vector<32x4xf32>
    %41 = arith.addf %40, %18 : vector<32x4xf32>
    %42 = arith.negf %41 : vector<32x4xf32>
    %43 = math.exp %42 : vector<32x4xf32>
    %cst_13 = arith.constant 1.000000e+00 : f32
    %44 = vector.broadcast %cst_13 : f32 to vector<32x4xf32>
    %45 = arith.addf %44, %43 : vector<32x4xf32>
    %46 = arith.divf %44, %45 : vector<32x4xf32>
    %47 = vector.extract_strided_slice %46 {offsets = [0, 0], sizes = [8, 4], strides = [1, 1]} : vector<32x4xf32> to vector<8x4xf32>
    %48 = vector.extract_strided_slice %46 {offsets = [8, 0], sizes = [8, 4], strides = [1, 1]} : vector<32x4xf32> to vector<8x4xf32>
    %49 = vector.extract_strided_slice %46 {offsets = [24, 0], sizes = [8, 4], strides = [1, 1]} : vector<32x4xf32> to vector<8x4xf32>
    %50 = vector.extract_strided_slice %41 {offsets = [16, 0], sizes = [8, 4], strides = [1, 1]} : vector<32x4xf32> to vector<8x4xf32>
    %51 = math.tanh %50 : vector<8x4xf32>
    %52 = arith.mulf %48, %19 : vector<8x4xf32>
    %53 = arith.mulf %47, %51 : vector<8x4xf32>
    %54 = arith.addf %52, %53 : vector<8x4xf32>
    %55 = math.tanh %54 : vector<8x4xf32>
    %56 = arith.mulf %49, %55 : vector<8x4xf32>
    %c1 = arith.constant 1 : index
    %c0_14 = arith.constant 0 : index
    %c0_15 = arith.constant 0 : index
    %57 = vector.load %arg4[%c1, %c0_14, %c0_15] : memref<8x32x4xf32, #tpu.memory_space<vmem>>, vector<1x32x4xf32>
    %58 = vector.shape_cast %57 : vector<1x32x4xf32> to vector<32x4xf32>
    %cst_16 = arith.constant dense<0.000000e+00> : vector<32x4xf32>
    %59 = tpu.matmul %1, %38, %cst_16 {dimension_numbers = #tpu.dot_dimension_numbers<[1], [0], [0], [1], [0, 0, 1, 1], [], []>} : vector<32x8xf32>, vector<8x4xf32>, vector<32x4xf32> -> vector<32x4xf32>
    %60 = arith.addf %58, %59 : vector<32x4xf32>
    %61 = arith.negf %60 : vector<32x4xf32>
    %62 = math.exp %61 : vector<32x4xf32>
    %cst_17 = arith.constant 1.000000e+00 : f32
    %63 = vector.broadcast %cst_17 : f32 to vector<32x4xf32>
    %64 = arith.addf %63, %62 : vector<32x4xf32>
    %65 = arith.divf %63, %64 : vector<32x4xf32>
    %66 = vector.extract_strided_slice %65 {offsets = [0, 0], sizes = [8, 4], strides = [1, 1]} : vector<32x4xf32> to vector<8x4xf32>
    %67 = vector.extract_strided_slice %65 {offsets = [8, 0], sizes = [8, 4], strides = [1, 1]} : vector<32x4xf32> to vector<8x4xf32>
    %68 = vector.extract_strided_slice %65 {offsets = [24, 0], sizes = [8, 4], strides = [1, 1]} : vector<32x4xf32> to vector<8x4xf32>
    %69 = vector.extract_strided_slice %60 {offsets = [16, 0], sizes = [8, 4], strides = [1, 1]} : vector<32x4xf32> to vector<8x4xf32>
    %70 = math.tanh %69 : vector<8x4xf32>
    %71 = arith.mulf %67, %36 : vector<8x4xf32>
    %72 = arith.mulf %66, %70 : vector<8x4xf32>
    %73 = arith.addf %71, %72 : vector<8x4xf32>
    %74 = math.tanh %73 : vector<8x4xf32>
    %75 = arith.mulf %68, %74 : vector<8x4xf32>
    %76 = tpu.concatenate %75, %56 in 0 : vector<8x4xf32>, vector<8x4xf32> -> vector<16x4xf32>
    %cst_18 = arith.constant dense<0.000000e+00> : vector<32x4xf32>
    %77 = tpu.matmul %2, %76, %cst_18 {dimension_numbers = #tpu.dot_dimension_numbers<[1], [0], [0], [1], [0, 0, 1, 1], [], []>} : vector<32x16xf32>, vector<16x4xf32>, vector<32x4xf32> -> vector<32x4xf32>
    %78 = arith.addf %77, %18 : vector<32x4xf32>
    %79 = arith.negf %78 : vector<32x4xf32>
    %80 = math.exp %79 : vector<32x4xf32>
    %cst_19 = arith.constant 1.000000e+00 : f32
    %81 = vector.broadcast %cst_19 : f32 to vector<32x4xf32>
    %82 = arith.addf %81, %80 : vector<32x4xf32>
    %83 = arith.divf %81, %82 : vector<32x4xf32>
    %84 = vector.extract_strided_slice %83 {offsets = [0, 0], sizes = [8, 4], strides = [1, 1]} : vector<32x4xf32> to vector<8x4xf32>
    %85 = vector.extract_strided_slice %83 {offsets = [8, 0], sizes = [8, 4], strides = [1, 1]} : vector<32x4xf32> to vector<8x4xf32>
    %86 = vector.extract_strided_slice %83 {offsets = [24, 0], sizes = [8, 4], strides = [1, 1]} : vector<32x4xf32> to vector<8x4xf32>
    %87 = vector.extract_strided_slice %78 {offsets = [16, 0], sizes = [8, 4], strides = [1, 1]} : vector<32x4xf32> to vector<8x4xf32>
    %88 = math.tanh %87 : vector<8x4xf32>
    %89 = arith.mulf %85, %54 : vector<8x4xf32>
    %90 = arith.mulf %84, %88 : vector<8x4xf32>
    %91 = arith.addf %89, %90 : vector<8x4xf32>
    %92 = math.tanh %91 : vector<8x4xf32>
    %93 = arith.mulf %86, %92 : vector<8x4xf32>
    %c2 = arith.constant 2 : index
    %c0_20 = arith.constant 0 : index
    %c0_21 = arith.constant 0 : index
    %94 = vector.load %arg4[%c2, %c0_20, %c0_21] : memref<8x32x4xf32, #tpu.memory_space<vmem>>, vector<1x32x4xf32>
    %95 = vector.shape_cast %94 : vector<1x32x4xf32> to vector<32x4xf32>
    %cst_22 = arith.constant dense<0.000000e+00> : vector<32x4xf32>
    %96 = tpu.matmul %1, %75, %cst_22 {dimension_numbers = #tpu.dot_dimension_numbers<[1], [0], [0], [1], [0, 0, 1, 1], [], []>} : vector<32x8xf32>, vector<8x4xf32>, vector<32x4xf32> -> vector<32x4xf32>
    %97 = arith.addf %95, %96 : vector<32x4xf32>
    %98 = arith.negf %97 : vector<32x4xf32>
    %99 = math.exp %98 : vector<32x4xf32>
    %cst_23 = arith.constant 1.000000e+00 : f32
    %100 = vector.broadcast %cst_23 : f32 to vector<32x4xf32>
    %101 = arith.addf %100, %99 : vector<32x4xf32>
    %102 = arith.divf %100, %101 : vector<32x4xf32>
    %103 = vector.extract_strided_slice %102 {offsets = [0, 0], sizes = [8, 4], strides = [1, 1]} : vector<32x4xf32> to vector<8x4xf32>
    %104 = vector.extract_strided_slice %102 {offsets = [8, 0], sizes = [8, 4], strides = [1, 1]} : vector<32x4xf32> to vector<8x4xf32>
    %105 = vector.extract_strided_slice %102 {offsets = [24, 0], sizes = [8, 4], strides = [1, 1]} : vector<32x4xf32> to vector<8x4xf32>
    %106 = vector.extract_strided_slice %97 {offsets = [16, 0], sizes = [8, 4], strides = [1, 1]} : vector<32x4xf32> to vector<8x4xf32>
    %107 = math.tanh %106 : vector<8x4xf32>
    %108 = arith.mulf %104, %73 : vector<8x4xf32>
    %109 = arith.mulf %103, %107 : vector<8x4xf32>
    %110 = arith.addf %108, %109 : vector<8x4xf32>
    %111 = math.tanh %110 : vector<8x4xf32>
    %112 = arith.mulf %105, %111 : vector<8x4xf32>
    %113 = tpu.concatenate %112, %93 in 0 : vector<8x4xf32>, vector<8x4xf32> -> vector<16x4xf32>
    %cst_24 = arith.constant dense<0.000000e+00> : vector<32x4xf32>
    %114 = tpu.matmul %2, %113, %cst_24 {dimension_numbers = #tpu.dot_dimension_numbers<[1], [0], [0], [1], [0, 0, 1, 1], [], []>} : vector<32x16xf32>, vector<16x4xf32>, vector<32x4xf32> -> vector<32x4xf32>
    %115 = arith.addf %114, %18 : vector<32x4xf32>
    %116 = arith.negf %115 : vector<32x4xf32>
    %117 = math.exp %116 : vector<32x4xf32>
    %cst_25 = arith.constant 1.000000e+00 : f32
    %118 = vector.broadcast %cst_25 : f32 to vector<32x4xf32>
    %119 = arith.addf %118, %117 : vector<32x4xf32>
    %120 = arith.divf %118, %119 : vector<32x4xf32>
    %121 = vector.extract_strided_slice %120 {offsets = [0, 0], sizes = [8, 4], strides = [1, 1]} : vector<32x4xf32> to vector<8x4xf32>
    %122 = vector.extract_strided_slice %120 {offsets = [8, 0], sizes = [8, 4], strides = [1, 1]} : vector<32x4xf32> to vector<8x4xf32>
    %123 = vector.extract_strided_slice %120 {offsets = [24, 0], sizes = [8, 4], strides = [1, 1]} : vector<32x4xf32> to vector<8x4xf32>
    %124 = vector.extract_strided_slice %115 {offsets = [16, 0], sizes = [8, 4], strides = [1, 1]} : vector<32x4xf32> to vector<8x4xf32>
    %125 = math.tanh %124 : vector<8x4xf32>
    %126 = arith.mulf %122, %91 : vector<8x4xf32>
    %127 = arith.mulf %121, %125 : vector<8x4xf32>
    %128 = arith.addf %126, %127 : vector<8x4xf32>
    %129 = math.tanh %128 : vector<8x4xf32>
    %130 = arith.mulf %123, %129 : vector<8x4xf32>
    %c3 = arith.constant 3 : index
    %c0_26 = arith.constant 0 : index
    %c0_27 = arith.constant 0 : index
    %131 = vector.load %arg4[%c3, %c0_26, %c0_27] : memref<8x32x4xf32, #tpu.memory_space<vmem>>, vector<1x32x4xf32>
    %132 = vector.shape_cast %131 : vector<1x32x4xf32> to vector<32x4xf32>
    %cst_28 = arith.constant dense<0.000000e+00> : vector<32x4xf32>
    %133 = tpu.matmul %1, %112, %cst_28 {dimension_numbers = #tpu.dot_dimension_numbers<[1], [0], [0], [1], [0, 0, 1, 1], [], []>} : vector<32x8xf32>, vector<8x4xf32>, vector<32x4xf32> -> vector<32x4xf32>
    %134 = arith.addf %132, %133 : vector<32x4xf32>
    %135 = arith.negf %134 : vector<32x4xf32>
    %136 = math.exp %135 : vector<32x4xf32>
    %cst_29 = arith.constant 1.000000e+00 : f32
    %137 = vector.broadcast %cst_29 : f32 to vector<32x4xf32>
    %138 = arith.addf %137, %136 : vector<32x4xf32>
    %139 = arith.divf %137, %138 : vector<32x4xf32>
    %140 = vector.extract_strided_slice %139 {offsets = [0, 0], sizes = [8, 4], strides = [1, 1]} : vector<32x4xf32> to vector<8x4xf32>
    %141 = vector.extract_strided_slice %139 {offsets = [8, 0], sizes = [8, 4], strides = [1, 1]} : vector<32x4xf32> to vector<8x4xf32>
    %142 = vector.extract_strided_slice %139 {offsets = [24, 0], sizes = [8, 4], strides = [1, 1]} : vector<32x4xf32> to vector<8x4xf32>
    %143 = vector.extract_strided_slice %134 {offsets = [16, 0], sizes = [8, 4], strides = [1, 1]} : vector<32x4xf32> to vector<8x4xf32>
    %144 = math.tanh %143 : vector<8x4xf32>
    %145 = arith.mulf %141, %110 : vector<8x4xf32>
    %146 = arith.mulf %140, %144 : vector<8x4xf32>
    %147 = arith.addf %145, %146 : vector<8x4xf32>
    %148 = math.tanh %147 : vector<8x4xf32>
    %149 = arith.mulf %142, %148 : vector<8x4xf32>
    %150 = tpu.concatenate %149, %130 in 0 : vector<8x4xf32>, vector<8x4xf32> -> vector<16x4xf32>
    %cst_30 = arith.constant dense<0.000000e+00> : vector<32x4xf32>
    %151 = tpu.matmul %2, %150, %cst_30 {dimension_numbers = #tpu.dot_dimension_numbers<[1], [0], [0], [1], [0, 0, 1, 1], [], []>} : vector<32x16xf32>, vector<16x4xf32>, vector<32x4xf32> -> vector<32x4xf32>
    %152 = arith.addf %151, %18 : vector<32x4xf32>
    %153 = arith.negf %152 : vector<32x4xf32>
    %154 = math.exp %153 : vector<32x4xf32>
    %cst_31 = arith.constant 1.000000e+00 : f32
    %155 = vector.broadcast %cst_31 : f32 to vector<32x4xf32>
    %156 = arith.addf %155, %154 : vector<32x4xf32>
    %157 = arith.divf %155, %156 : vector<32x4xf32>
    %158 = vector.extract_strided_slice %157 {offsets = [0, 0], sizes = [8, 4], strides = [1, 1]} : vector<32x4xf32> to vector<8x4xf32>
    %159 = vector.extract_strided_slice %157 {offsets = [8, 0], sizes = [8, 4], strides = [1, 1]} : vector<32x4xf32> to vector<8x4xf32>
    %160 = vector.extract_strided_slice %157 {offsets = [24, 0], sizes = [8, 4], strides = [1, 1]} : vector<32x4xf32> to vector<8x4xf32>
    %161 = vector.extract_strided_slice %152 {offsets = [16, 0], sizes = [8, 4], strides = [1, 1]} : vector<32x4xf32> to vector<8x4xf32>
    %162 = math.tanh %161 : vector<8x4xf32>
    %163 = arith.mulf %159, %128 : vector<8x4xf32>
    %164 = arith.mulf %158, %162 : vector<8x4xf32>
    %165 = arith.addf %163, %164 : vector<8x4xf32>
    %166 = math.tanh %165 : vector<8x4xf32>
    %167 = arith.mulf %160, %166 : vector<8x4xf32>
    %c4 = arith.constant 4 : index
    %c0_32 = arith.constant 0 : index
    %c0_33 = arith.constant 0 : index
    %168 = vector.load %arg4[%c4, %c0_32, %c0_33] : memref<8x32x4xf32, #tpu.memory_space<vmem>>, vector<1x32x4xf32>
    %169 = vector.shape_cast %168 : vector<1x32x4xf32> to vector<32x4xf32>
    %cst_34 = arith.constant dense<0.000000e+00> : vector<32x4xf32>
    %170 = tpu.matmul %1, %149, %cst_34 {dimension_numbers = #tpu.dot_dimension_numbers<[1], [0], [0], [1], [0, 0, 1, 1], [], []>} : vector<32x8xf32>, vector<8x4xf32>, vector<32x4xf32> -> vector<32x4xf32>
    %171 = arith.addf %169, %170 : vector<32x4xf32>
    %172 = arith.negf %171 : vector<32x4xf32>
    %173 = math.exp %172 : vector<32x4xf32>
    %cst_35 = arith.constant 1.000000e+00 : f32
    %174 = vector.broadcast %cst_35 : f32 to vector<32x4xf32>
    %175 = arith.addf %174, %173 : vector<32x4xf32>
    %176 = arith.divf %174, %175 : vector<32x4xf32>
    %177 = vector.extract_strided_slice %176 {offsets = [0, 0], sizes = [8, 4], strides = [1, 1]} : vector<32x4xf32> to vector<8x4xf32>
    %178 = vector.extract_strided_slice %176 {offsets = [8, 0], sizes = [8, 4], strides = [1, 1]} : vector<32x4xf32> to vector<8x4xf32>
    %179 = vector.extract_strided_slice %176 {offsets = [24, 0], sizes = [8, 4], strides = [1, 1]} : vector<32x4xf32> to vector<8x4xf32>
    %180 = vector.extract_strided_slice %171 {offsets = [16, 0], sizes = [8, 4], strides = [1, 1]} : vector<32x4xf32> to vector<8x4xf32>
    %181 = math.tanh %180 : vector<8x4xf32>
    %182 = arith.mulf %178, %147 : vector<8x4xf32>
    %183 = arith.mulf %177, %181 : vector<8x4xf32>
    %184 = arith.addf %182, %183 : vector<8x4xf32>
    %185 = math.tanh %184 : vector<8x4xf32>
    %186 = arith.mulf %179, %185 : vector<8x4xf32>
    %187 = tpu.concatenate %186, %167 in 0 : vector<8x4xf32>, vector<8x4xf32> -> vector<16x4xf32>
    %cst_36 = arith.constant dense<0.000000e+00> : vector<32x4xf32>
    %188 = tpu.matmul %2, %187, %cst_36 {dimension_numbers = #tpu.dot_dimension_numbers<[1], [0], [0], [1], [0, 0, 1, 1], [], []>} : vector<32x16xf32>, vector<16x4xf32>, vector<32x4xf32> -> vector<32x4xf32>
    %189 = arith.addf %188, %18 : vector<32x4xf32>
    %190 = arith.negf %189 : vector<32x4xf32>
    %191 = math.exp %190 : vector<32x4xf32>
    %cst_37 = arith.constant 1.000000e+00 : f32
    %192 = vector.broadcast %cst_37 : f32 to vector<32x4xf32>
    %193 = arith.addf %192, %191 : vector<32x4xf32>
    %194 = arith.divf %192, %193 : vector<32x4xf32>
    %195 = vector.extract_strided_slice %194 {offsets = [0, 0], sizes = [8, 4], strides = [1, 1]} : vector<32x4xf32> to vector<8x4xf32>
    %196 = vector.extract_strided_slice %194 {offsets = [8, 0], sizes = [8, 4], strides = [1, 1]} : vector<32x4xf32> to vector<8x4xf32>
    %197 = vector.extract_strided_slice %194 {offsets = [24, 0], sizes = [8, 4], strides = [1, 1]} : vector<32x4xf32> to vector<8x4xf32>
    %198 = vector.extract_strided_slice %189 {offsets = [16, 0], sizes = [8, 4], strides = [1, 1]} : vector<32x4xf32> to vector<8x4xf32>
    %199 = math.tanh %198 : vector<8x4xf32>
    %200 = arith.mulf %196, %165 : vector<8x4xf32>
    %201 = arith.mulf %195, %199 : vector<8x4xf32>
    %202 = arith.addf %200, %201 : vector<8x4xf32>
    %203 = math.tanh %202 : vector<8x4xf32>
    %204 = arith.mulf %197, %203 : vector<8x4xf32>
    %c5 = arith.constant 5 : index
    %c0_38 = arith.constant 0 : index
    %c0_39 = arith.constant 0 : index
    %205 = vector.load %arg4[%c5, %c0_38, %c0_39] : memref<8x32x4xf32, #tpu.memory_space<vmem>>, vector<1x32x4xf32>
    %206 = vector.shape_cast %205 : vector<1x32x4xf32> to vector<32x4xf32>
    %cst_40 = arith.constant dense<0.000000e+00> : vector<32x4xf32>
    %207 = tpu.matmul %1, %186, %cst_40 {dimension_numbers = #tpu.dot_dimension_numbers<[1], [0], [0], [1], [0, 0, 1, 1], [], []>} : vector<32x8xf32>, vector<8x4xf32>, vector<32x4xf32> -> vector<32x4xf32>
    %208 = arith.addf %206, %207 : vector<32x4xf32>
    %209 = arith.negf %208 : vector<32x4xf32>
    %210 = math.exp %209 : vector<32x4xf32>
    %cst_41 = arith.constant 1.000000e+00 : f32
    %211 = vector.broadcast %cst_41 : f32 to vector<32x4xf32>
    %212 = arith.addf %211, %210 : vector<32x4xf32>
    %213 = arith.divf %211, %212 : vector<32x4xf32>
    %214 = vector.extract_strided_slice %213 {offsets = [0, 0], sizes = [8, 4], strides = [1, 1]} : vector<32x4xf32> to vector<8x4xf32>
    %215 = vector.extract_strided_slice %213 {offsets = [8, 0], sizes = [8, 4], strides = [1, 1]} : vector<32x4xf32> to vector<8x4xf32>
    %216 = vector.extract_strided_slice %213 {offsets = [24, 0], sizes = [8, 4], strides = [1, 1]} : vector<32x4xf32> to vector<8x4xf32>
    %217 = vector.extract_strided_slice %208 {offsets = [16, 0], sizes = [8, 4], strides = [1, 1]} : vector<32x4xf32> to vector<8x4xf32>
    %218 = math.tanh %217 : vector<8x4xf32>
    %219 = arith.mulf %215, %184 : vector<8x4xf32>
    %220 = arith.mulf %214, %218 : vector<8x4xf32>
    %221 = arith.addf %219, %220 : vector<8x4xf32>
    %222 = math.tanh %221 : vector<8x4xf32>
    %223 = arith.mulf %216, %222 : vector<8x4xf32>
    %224 = tpu.concatenate %223, %204 in 0 : vector<8x4xf32>, vector<8x4xf32> -> vector<16x4xf32>
    %cst_42 = arith.constant dense<0.000000e+00> : vector<32x4xf32>
    %225 = tpu.matmul %2, %224, %cst_42 {dimension_numbers = #tpu.dot_dimension_numbers<[1], [0], [0], [1], [0, 0, 1, 1], [], []>} : vector<32x16xf32>, vector<16x4xf32>, vector<32x4xf32> -> vector<32x4xf32>
    %226 = arith.addf %225, %18 : vector<32x4xf32>
    %227 = arith.negf %226 : vector<32x4xf32>
    %228 = math.exp %227 : vector<32x4xf32>
    %cst_43 = arith.constant 1.000000e+00 : f32
    %229 = vector.broadcast %cst_43 : f32 to vector<32x4xf32>
    %230 = arith.addf %229, %228 : vector<32x4xf32>
    %231 = arith.divf %229, %230 : vector<32x4xf32>
    %232 = vector.extract_strided_slice %231 {offsets = [0, 0], sizes = [8, 4], strides = [1, 1]} : vector<32x4xf32> to vector<8x4xf32>
    %233 = vector.extract_strided_slice %231 {offsets = [8, 0], sizes = [8, 4], strides = [1, 1]} : vector<32x4xf32> to vector<8x4xf32>
    %234 = vector.extract_strided_slice %231 {offsets = [24, 0], sizes = [8, 4], strides = [1, 1]} : vector<32x4xf32> to vector<8x4xf32>
    %235 = vector.extract_strided_slice %226 {offsets = [16, 0], sizes = [8, 4], strides = [1, 1]} : vector<32x4xf32> to vector<8x4xf32>
    %236 = math.tanh %235 : vector<8x4xf32>
    %237 = arith.mulf %233, %202 : vector<8x4xf32>
    %238 = arith.mulf %232, %236 : vector<8x4xf32>
    %239 = arith.addf %237, %238 : vector<8x4xf32>
    %240 = math.tanh %239 : vector<8x4xf32>
    %241 = arith.mulf %234, %240 : vector<8x4xf32>
    %c6 = arith.constant 6 : index
    %c0_44 = arith.constant 0 : index
    %c0_45 = arith.constant 0 : index
    %242 = vector.load %arg4[%c6, %c0_44, %c0_45] : memref<8x32x4xf32, #tpu.memory_space<vmem>>, vector<1x32x4xf32>
    %243 = vector.shape_cast %242 : vector<1x32x4xf32> to vector<32x4xf32>
    %cst_46 = arith.constant dense<0.000000e+00> : vector<32x4xf32>
    %244 = tpu.matmul %1, %223, %cst_46 {dimension_numbers = #tpu.dot_dimension_numbers<[1], [0], [0], [1], [0, 0, 1, 1], [], []>} : vector<32x8xf32>, vector<8x4xf32>, vector<32x4xf32> -> vector<32x4xf32>
    %245 = arith.addf %243, %244 : vector<32x4xf32>
    %246 = arith.negf %245 : vector<32x4xf32>
    %247 = math.exp %246 : vector<32x4xf32>
    %cst_47 = arith.constant 1.000000e+00 : f32
    %248 = vector.broadcast %cst_47 : f32 to vector<32x4xf32>
    %249 = arith.addf %248, %247 : vector<32x4xf32>
    %250 = arith.divf %248, %249 : vector<32x4xf32>
    %251 = vector.extract_strided_slice %250 {offsets = [0, 0], sizes = [8, 4], strides = [1, 1]} : vector<32x4xf32> to vector<8x4xf32>
    %252 = vector.extract_strided_slice %250 {offsets = [8, 0], sizes = [8, 4], strides = [1, 1]} : vector<32x4xf32> to vector<8x4xf32>
    %253 = vector.extract_strided_slice %250 {offsets = [24, 0], sizes = [8, 4], strides = [1, 1]} : vector<32x4xf32> to vector<8x4xf32>
    %254 = vector.extract_strided_slice %245 {offsets = [16, 0], sizes = [8, 4], strides = [1, 1]} : vector<32x4xf32> to vector<8x4xf32>
    %255 = math.tanh %254 : vector<8x4xf32>
    %256 = arith.mulf %252, %221 : vector<8x4xf32>
    %257 = arith.mulf %251, %255 : vector<8x4xf32>
    %258 = arith.addf %256, %257 : vector<8x4xf32>
    %259 = math.tanh %258 : vector<8x4xf32>
    %260 = arith.mulf %253, %259 : vector<8x4xf32>
    %261 = tpu.concatenate %260, %241 in 0 : vector<8x4xf32>, vector<8x4xf32> -> vector<16x4xf32>
    %cst_48 = arith.constant dense<0.000000e+00> : vector<32x4xf32>
    %262 = tpu.matmul %2, %261, %cst_48 {dimension_numbers = #tpu.dot_dimension_numbers<[1], [0], [0], [1], [0, 0, 1, 1], [], []>} : vector<32x16xf32>, vector<16x4xf32>, vector<32x4xf32> -> vector<32x4xf32>
    %263 = arith.addf %262, %18 : vector<32x4xf32>
    %264 = arith.negf %263 : vector<32x4xf32>
    %265 = math.exp %264 : vector<32x4xf32>
    %cst_49 = arith.constant 1.000000e+00 : f32
    %266 = vector.broadcast %cst_49 : f32 to vector<32x4xf32>
    %267 = arith.addf %266, %265 : vector<32x4xf32>
    %268 = arith.divf %266, %267 : vector<32x4xf32>
    %269 = vector.extract_strided_slice %268 {offsets = [0, 0], sizes = [8, 4], strides = [1, 1]} : vector<32x4xf32> to vector<8x4xf32>
    %270 = vector.extract_strided_slice %268 {offsets = [8, 0], sizes = [8, 4], strides = [1, 1]} : vector<32x4xf32> to vector<8x4xf32>
    %271 = vector.extract_strided_slice %268 {offsets = [24, 0], sizes = [8, 4], strides = [1, 1]} : vector<32x4xf32> to vector<8x4xf32>
    %272 = vector.extract_strided_slice %263 {offsets = [16, 0], sizes = [8, 4], strides = [1, 1]} : vector<32x4xf32> to vector<8x4xf32>
    %273 = math.tanh %272 : vector<8x4xf32>
    %274 = arith.mulf %270, %239 : vector<8x4xf32>
    %275 = arith.mulf %269, %273 : vector<8x4xf32>
    %276 = arith.addf %274, %275 : vector<8x4xf32>
    %277 = math.tanh %276 : vector<8x4xf32>
    %278 = arith.mulf %271, %277 : vector<8x4xf32>
    %c7 = arith.constant 7 : index
    %c0_50 = arith.constant 0 : index
    %c0_51 = arith.constant 0 : index
    %279 = vector.load %arg4[%c7, %c0_50, %c0_51] : memref<8x32x4xf32, #tpu.memory_space<vmem>>, vector<1x32x4xf32>
    %280 = vector.shape_cast %279 : vector<1x32x4xf32> to vector<32x4xf32>
    %cst_52 = arith.constant dense<0.000000e+00> : vector<32x4xf32>
    %281 = tpu.matmul %1, %260, %cst_52 {dimension_numbers = #tpu.dot_dimension_numbers<[1], [0], [0], [1], [0, 0, 1, 1], [], []>} : vector<32x8xf32>, vector<8x4xf32>, vector<32x4xf32> -> vector<32x4xf32>
    %282 = arith.addf %280, %281 : vector<32x4xf32>
    %283 = arith.negf %282 : vector<32x4xf32>
    %284 = math.exp %283 : vector<32x4xf32>
    %cst_53 = arith.constant 1.000000e+00 : f32
    %285 = vector.broadcast %cst_53 : f32 to vector<32x4xf32>
    %286 = arith.addf %285, %284 : vector<32x4xf32>
    %287 = arith.divf %285, %286 : vector<32x4xf32>
    %288 = vector.extract_strided_slice %287 {offsets = [0, 0], sizes = [8, 4], strides = [1, 1]} : vector<32x4xf32> to vector<8x4xf32>
    %289 = vector.extract_strided_slice %287 {offsets = [8, 0], sizes = [8, 4], strides = [1, 1]} : vector<32x4xf32> to vector<8x4xf32>
    %290 = vector.extract_strided_slice %287 {offsets = [24, 0], sizes = [8, 4], strides = [1, 1]} : vector<32x4xf32> to vector<8x4xf32>
    %291 = vector.extract_strided_slice %282 {offsets = [16, 0], sizes = [8, 4], strides = [1, 1]} : vector<32x4xf32> to vector<8x4xf32>
    %292 = math.tanh %291 : vector<8x4xf32>
    %293 = arith.mulf %289, %258 : vector<8x4xf32>
    %294 = arith.mulf %288, %292 : vector<8x4xf32>
    %295 = arith.addf %293, %294 : vector<8x4xf32>
    %296 = math.tanh %295 : vector<8x4xf32>
    %297 = arith.mulf %290, %296 : vector<8x4xf32>
    %298 = tpu.concatenate %297, %278 in 0 : vector<8x4xf32>, vector<8x4xf32> -> vector<16x4xf32>
    %cst_54 = arith.constant dense<0.000000e+00> : vector<32x4xf32>
    %299 = tpu.matmul %2, %298, %cst_54 {dimension_numbers = #tpu.dot_dimension_numbers<[1], [0], [0], [1], [0, 0, 1, 1], [], []>} : vector<32x16xf32>, vector<16x4xf32>, vector<32x4xf32> -> vector<32x4xf32>
    %300 = arith.addf %299, %18 : vector<32x4xf32>
    %301 = arith.negf %300 : vector<32x4xf32>
    %302 = math.exp %301 : vector<32x4xf32>
    %cst_55 = arith.constant 1.000000e+00 : f32
    %303 = vector.broadcast %cst_55 : f32 to vector<32x4xf32>
    %304 = arith.addf %303, %302 : vector<32x4xf32>
    %305 = arith.divf %303, %304 : vector<32x4xf32>
    %306 = vector.extract_strided_slice %305 {offsets = [0, 0], sizes = [8, 4], strides = [1, 1]} : vector<32x4xf32> to vector<8x4xf32>
    %307 = vector.extract_strided_slice %305 {offsets = [8, 0], sizes = [8, 4], strides = [1, 1]} : vector<32x4xf32> to vector<8x4xf32>
    %308 = vector.extract_strided_slice %305 {offsets = [24, 0], sizes = [8, 4], strides = [1, 1]} : vector<32x4xf32> to vector<8x4xf32>
    %309 = vector.extract_strided_slice %300 {offsets = [16, 0], sizes = [8, 4], strides = [1, 1]} : vector<32x4xf32> to vector<8x4xf32>
    %310 = math.tanh %309 : vector<8x4xf32>
    %311 = arith.mulf %307, %276 : vector<8x4xf32>
    %312 = arith.mulf %306, %310 : vector<8x4xf32>
    %313 = arith.addf %311, %312 : vector<8x4xf32>
    %314 = math.tanh %313 : vector<8x4xf32>
    %315 = arith.mulf %308, %314 : vector<8x4xf32>
    %cst_56 = arith.constant dense<0.000000e+00> : vector<4x4xf32>
    %316 = tpu.matmul %6, %315, %cst_56 {dimension_numbers = #tpu.dot_dimension_numbers<[1], [0], [0], [1], [0, 0, 1, 1], [], []>} : vector<4x8xf32>, vector<8x4xf32>, vector<4x4xf32> -> vector<4x4xf32>
    %317 = vector.broadcast %7 : vector<4x1xf32> to vector<4x4xf32>
    %318 = arith.addf %316, %317 : vector<4x4xf32>
    %c0_57 = arith.constant 0 : index
    %c0_58 = arith.constant 0 : index
    %319 = vector.load %arg3[%c0_57, %c0_58] : memref<4x4xf32, #tpu.memory_space<vmem>>, vector<4x4xf32>
    tpu.vector_store %arg3[%c0_57, %c0_58], %318 {strides = array<i32>} : memref<4x4xf32, #tpu.memory_space<vmem>>, vector<4x4xf32>,
    return
  }
  func.func @transform_0(%arg0: i32) -> (i32, i32, i32) {
    %c0_i32 = arith.constant 0 : i32
    %c0_i32_0 = arith.constant 0 : i32
    %c0_i32_1 = arith.constant 0 : i32
    return %c0_i32, %c0_i32_0, %arg0 : i32, i32, i32
  }
  func.func @transform_1(%arg0: i32) -> (i32, i32) {
    %c0_i32 = arith.constant 0 : i32
    %c0_i32_0 = arith.constant 0 : i32
    %c0_i32_1 = arith.constant 0 : i32
    return %c0_i32, %c0_i32_0 : i32, i32
  }
  func.func @transform_2(%arg0: i32) -> (i32, i32) {
    %c0_i32 = arith.constant 0 : i32
    %c0_i32_0 = arith.constant 0 : i32
    return %c0_i32, %arg0 : i32, i32
  }
}

</mosaic_0001>

<bundles_post_ra>
// kernel: crime_model_lstm.1
= control target key start
LH: loop header
LB: loop body
LE: loop exit
PB: predicated region body
PF: predicated region fallthrough
CT: control target
= control target key end

     0   :  { %vm200_vm0 = vcmask 64512   ;;  %v2199_v0 = vmov 0.0   ;;  %v2200_v1 = vmov 25   ;;  %v2201_v3 = vmov 24   ;;  %s2202_s17 = smov 120   ;;  %s2204_s21 = smov 101   ;;  %s2974_s1 = inlined_call_operand.vmem [shape: f32[32,36], index: 1, kind: input, shape index: {}]   ;;  %s2975_s0 = inlined_call_operand.vmem [shape: f32[8,1,4], index: 0, kind: input, shape index: {}]   ;;  %s2976_s2 = inlined_call_operand.vmem [shape: f32[4,4], index: 2, kind: output, shape index: {}]  }
   0x1   :  { %224 = vmatpush.msra.mxu0 %v2199_v0  ;;  %1920 = vset.pattern.permute.xlu1 %v2200_v1  ;;  %v2224_v2 = vld [vmem:[%s2974_s1] sm:$0xff]  ;;  %v2230_v4 = vld [vmem:[%s2974_s1 + $0x18] sm:$0xff]  ;;  %v2239_v5 = vld [vmem:[%s2974_s1 + $0x8] sm:$0xff]  ;;  %vm147_vm1 = vcmask 31744   ;;  %vm313_vm14 = vcmask 130048  }
   0x2   :  { %1919 = vset.pattern.permute.xlu0 %v2201_v3  ;;  %100 = vperm.xlu1 %1920, %v2224_v2   ;;  %v2249_v6 = vld [vmem:[%s2974_s1 + $0x10] sm:$0xff]  ;;  %v2264_v8 = vld [vmem:[%s2975_s0] ss:$0 sm:$0xff]  ;;  %v2269_v9 = vld [vmem:[%s2975_s0 + $0x1] ss:$0 sm:$0xff] }
   0x3   :  { %49 = vperm.xlu0 %1919, %v2224_v2   ;;  %1799 = vmatmul.msk.f32.vlgmr.msra.gmra.mxu0 %vm200_vm0, %v2224_v2  ;;  %v2274_v10 = vld [vmem:[%s2975_s0 + $0x2] ss:$0 sm:$0xff]  ;;  %v2279_v11 = vld [vmem:[%s2975_s0 + $0x3] ss:$0 sm:$0xff]  ;;  %v2284_v12 = vld [vmem:[%s2975_s0 + $0x4] ss:$0 sm:$0xff] }
   0x4   :  { %1921 = vset.pattern.permute.xlu2 %v2201_v3  ;;  %v2292_v16 = vld [vmem:[%s2975_s0 + $0x5] ss:$0 sm:$0xff]  ;;  %v2298_v18 = vld [vmem:[%s2975_s0 + $0x6] ss:$0 sm:$0xff]  ;;  %v2304_v20 = vld [vmem:[%s2975_s0 + $0x7] ss:$0 sm:$0xff] }
   0x5   :  { %64 = vperm.xlu2 %1921, %v2230_v4  }
   0xa   :  { %104 = vperm.xlu1 %1920, %v2239_v5  }
   0xb   :  { %54 = vperm.xlu0 %1919, %v2239_v5   ;;  %1800 = vmatmul.msk.f32.gmra.mxu0 %vm200_vm0, %v2239_v5 }
   0xd   :  { %1922 = vset.pattern.permute.xlu2 %v2200_v1 }
   0xe   :  { %112 = vperm.xlu2 %1922, %v2230_v4  }
  0x12   :  { %108 = vperm.xlu1 %1920, %v2249_v6  }
  0x13   :  { %59 = vperm.xlu0 %1919, %v2249_v6   ;;  %1801 = vmatmul.msk.f32.gmra.mxu0 %vm200_vm0, %v2249_v6 }
  0x16   :  { %305 = vrot.lane.b32.xlu2 %v2224_v2, %s2202_s17 }
  0x1a   :  { %309 = vrot.lane.b32.xlu1 %v2249_v6, %s2202_s17 }
  0x1b   :  { %1802 = vmatmul.msk.f32.gmra.mxu0 %vm200_vm0, %v2230_v4  ;;  %307 = vrot.lane.b32.xlu0 %v2239_v5, %s2202_s17 }
  0x1e   :  { %311 = vrot.lane.b32.xlu2 %v2230_v4, %s2202_s17 }
  0x5f   :  { %v65_v7 = vpop.permute.xlu2 %64 }
  0x60   :  { %v70_v13 = vmul.f32 %v2264_v8, %v65_v7  ;;  %v74_v14 = vmul.f32 %v2269_v9, %v65_v7  ;;  %v78_v15 = vmul.f32 %v2274_v10, %v65_v7  ;;  %v82_v17 = vmul.f32 %v2279_v11, %v65_v7 }
  0x61   :  { %v86_v19 = vmul.f32 %v2284_v12, %v65_v7  ;;  %v90_v21 = vmul.f32 %v2292_v16, %v65_v7  ;;  %v94_v23 = vmul.f32 %v2298_v18, %v65_v7  ;;  %v98_v27 = vmul.f32 %v2304_v20, %v65_v7 }
  0x68   :  { %v113_v22 = vpop.permute.xlu2 %112 }
  0x69   :  { %v118_v24 = vadd.f32 %v113_v22, %v70_v13  ;;  %v122_v25 = vadd.f32 %v113_v22, %v74_v14  ;;  %v126_v26 = vadd.f32 %v113_v22, %v78_v15  ;;  %v130_v28 = vadd.f32 %v113_v22, %v82_v17 }
  0x6a   :  { %v134_v29 = vadd.f32 %v113_v22, %v86_v19  ;;  %v138_v30 = vadd.f32 %v113_v22, %v90_v21  ;;  %v142_v31 = vadd.f32 %v113_v22, %v94_v23  ;;  %v146_v33 = vadd.f32 %v113_v22, %v98_v27 }
  0x6b   :  { %151 = vst.msk [vmem:[#allocation2 + $0x18] sm:$0xff] %vm147_vm1, %v118_v24 }
  0x6c   :  { %155 = vst.msk [vmem:[#allocation2 + $0x38] sm:$0xff] %vm147_vm1, %v122_v25 }
  0x6d   :  { %159 = vst.msk [vmem:[#allocation2 + $0x58] sm:$0xff] %vm147_vm1, %v126_v26 }
  0x6e   :  { %163 = vst.msk [vmem:[#allocation2 + $0x78] sm:$0xff] %vm147_vm1, %v130_v28 }
  0x6f   :  { %167 = vst.msk [vmem:[#allocation2 + $0x98] sm:$0xff] %vm147_vm1, %v134_v29 }
  0x70   :  { %171 = vst.msk [vmem:[#allocation2 + $0xb8] sm:$0xff] %vm147_vm1, %v138_v30 }
  0x71   :  { %175 = vst.msk [vmem:[#allocation2 + $0xd8] sm:$0xff] %vm147_vm1, %v142_v31 }
  0x72   :  { %179 = vst.msk [vmem:[#allocation2 + $0xf8] sm:$0xff] %vm147_vm1, %v146_v33 }
  0x74   :  { %v101_v32 = vpop.permute.xlu1 %100 }
  0x75   :  { %v50_v34 = vpop.permute.xlu0 %49 }
  0x76   :  { %v67_v35 = vmul.f32 %v2264_v8, %v50_v34  ;;  %v71_v36 = vmul.f32 %v2269_v9, %v50_v34  ;;  %v75_v37 = vmul.f32 %v2274_v10, %v50_v34  ;;  %v79_v38 = vmul.f32 %v2279_v11, %v50_v34 }
  0x77   :  { %v83_v39 = vmul.f32 %v2284_v12, %v50_v34  ;;  %v87_v40 = vmul.f32 %v2292_v16, %v50_v34  ;;  %v91_v41 = vmul.f32 %v2298_v18, %v50_v34  ;;  %v95_v45 = vmul.f32 %v2304_v20, %v50_v34 }
  0x78   :  { %v115_v42 = vadd.f32 %v101_v32, %v67_v35  ;;  %v119_v43 = vadd.f32 %v101_v32, %v71_v36  ;;  %v123_v44 = vadd.f32 %v101_v32, %v75_v37  ;;  %v127_v46 = vadd.f32 %v101_v32, %v79_v38 }
  0x79   :  { %v131_v47 = vadd.f32 %v101_v32, %v83_v39  ;;  %v135_v48 = vadd.f32 %v101_v32, %v87_v40  ;;  %v139_v49 = vadd.f32 %v101_v32, %v91_v41  ;;  %v143_v50 = vadd.f32 %v101_v32, %v95_v45 }
  0x7a   :  { %148 = vst.msk [vmem:[#allocation2] sm:$0xff] %vm147_vm1, %v115_v42 }
  0x7b   :  { %152 = vst.msk [vmem:[#allocation2 + $0x20] sm:$0xff] %vm147_vm1, %v119_v43  ;;  %v199_v43 = vld [vmem:[#allocation2 + $0x18] sm:$0xff] }
  0x7c   :  { %156 = vst.msk [vmem:[#allocation2 + $0x40] sm:$0xff] %vm147_vm1, %v123_v44  ;;  %v105_v51 = vpop.permute.xlu1 %104 }
  0x7d   :  { %160 = vst.msk [vmem:[#allocation2 + $0x60] sm:$0xff] %vm147_vm1, %v127_v46  ;;  %v55_v52 = vpop.permute.xlu0 %54 }
  0x7e   :  { %164 = vst.msk [vmem:[#allocation2 + $0x80] sm:$0xff] %vm147_vm1, %v131_v47  ;;  %v68_v53 = vmul.f32 %v2264_v8, %v55_v52  ;;  %v72_v54 = vmul.f32 %v2269_v9, %v55_v52  ;;  %v76_v55 = vmul.f32 %v2274_v10, %v55_v52  ;;  %v80_v56 = vmul.f32 %v2279_v11, %v55_v52 }
  0x7f   :  { %168 = vst.msk [vmem:[#allocation2 + $0xa0] sm:$0xff] %vm147_vm1, %v135_v48  ;;  %v84_v57 = vmul.f32 %v2284_v12, %v55_v52  ;;  %v88_v58 = vmul.f32 %v2292_v16, %v55_v52  ;;  %v92_v59 = vmul.f32 %v2298_v18, %v55_v52  ;;  %v96_v0 = vmul.f32 %v2304_v20, %v55_v52 }
  0x80   :  { %172 = vst.msk [vmem:[#allocation2 + $0xc0] sm:$0xff] %vm147_vm1, %v139_v49  ;;  %v116_v60 = vadd.f32 %v105_v51, %v68_v53  ;;  %v120_v61 = vadd.f32 %v105_v51, %v72_v54  ;;  %v124_v62 = vadd.f32 %v105_v51, %v76_v55  ;;  %v226_v63 = vpop.f32.mrf.mxu0  ;;  %v128_v1 = vadd.f32 %v105_v51, %v80_v56 }
  0x81   :  { %176 = vst.msk [vmem:[#allocation2 + $0xe0] sm:$0xff] %vm147_vm1, %v143_v50  ;;  %v196_v3 = vld [vmem:[#allocation2] sm:$0xff]  ;;  %v132_v7 = vadd.f32 %v105_v51, %v84_v57  ;;  %v136_v14 = vadd.f32 %v105_v51, %v88_v58  ;;  %v140_v15 = vadd.f32 %v105_v51, %v92_v59  ;;  %v144_v19 = vadd.f32 %v105_v51, %v96_v0 }
  0x82   :  { %149 = vst.msk [vmem:[#allocation2 + $0x8] sm:$0xff] %vm147_vm1, %v116_v60  ;;  %v238_v13 = vadd.f32 %v226_v63, %v196_v3 }
  0x83   :  { %153 = vst.msk [vmem:[#allocation2 + $0x28] sm:$0xff] %vm147_vm1, %v120_v61  ;;  %v2203_v61 = vmov 26  }
  0x84   :  { %157 = vst.msk [vmem:[#allocation2 + $0x48] sm:$0xff] %vm147_vm1, %v124_v62  ;;  %v1803_v17 = vmul.f32 -1.442695, %v238_v13  ;;  %v109_v25 = vpop.permute.xlu1 %108  ;;  %1923 = vset.pattern.permute.xlu0 %v2203_v61  ;;  %1924 = vset.pattern.permute.xlu1 %v2203_v61 }
  0x85   :  { %161 = vst.msk [vmem:[#allocation2 + $0x68] sm:$0xff] %vm147_vm1, %v128_v1  ;;  %v60_v21 = vpop.permute.xlu0 %59  ;;  %181 = vperm.xlu0 %1923, %v2224_v2   ;;  %185 = vperm.xlu1 %1924, %v2239_v5  }
  0x86   :  { %165 = vst.msk [vmem:[#allocation2 + $0x88] sm:$0xff] %vm147_vm1, %v132_v7  ;;  %1935 = vpow2.f32 %v1803_v17  ;;  %v69_v22 = vmul.f32 %v2264_v8, %v60_v21  ;;  %v73_v23 = vmul.f32 %v2269_v9, %v60_v21  ;;  %v77_v24 = vmul.f32 %v2274_v10, %v60_v21  ;;  %1925 = vset.pattern.permute.xlu2 %v2203_v61 }
  0x87   :  { %169 = vst.msk [vmem:[#allocation2 + $0xa8] sm:$0xff] %vm147_vm1, %v136_v14  ;;  %v81_v26 = vmul.f32 %v2279_v11, %v60_v21  ;;  %v85_v27 = vmul.f32 %v2284_v12, %v60_v21  ;;  %v89_v28 = vmul.f32 %v2292_v16, %v60_v21  ;;  %v93_v29 = vmul.f32 %v2298_v18, %v60_v21 }
  0x88   :  { %173 = vst.msk [vmem:[#allocation2 + $0xc8] sm:$0xff] %vm147_vm1, %v140_v15  ;;  %v117_v30 = vadd.f32 %v109_v25, %v69_v22  ;;  %v121_v31 = vadd.f32 %v109_v25, %v73_v23  ;;  %v125_v8 = vadd.f32 %v109_v25, %v77_v24  ;;  %v229_v32 = vpop.f32.mrf.mxu0  ;;  %v97_v9 = vmul.f32 %v2304_v20, %v60_v21 }
  0x89   :  { %177 = vst.msk [vmem:[#allocation2 + $0xe8] sm:$0xff] %vm147_vm1, %v144_v19  ;;  %v129_v10 = vadd.f32 %v109_v25, %v81_v26  ;;  %v197_v33 = vld [vmem:[#allocation2 + $0x8] sm:$0xff]  ;;  %v133_v34 = vadd.f32 %v109_v25, %v85_v27  ;;  %v137_v12 = vadd.f32 %v109_v25, %v89_v28  ;;  %v141_v35 = vadd.f32 %v109_v25, %v93_v29 }
  0x8a   :  { %150 = vst.msk [vmem:[#allocation2 + $0x10] sm:$0xff] %vm147_vm1, %v117_v30  ;;  %v239_v11 = vadd.f32 %v229_v32, %v197_v33  ;;  %v145_v37 = vadd.f32 %v109_v25, %v97_v9  ;;  %193 = vperm.xlu2 %1925, %v2230_v4   ;;  %v2379_v32 = vpop.permute.xlu2 %305 }
  0x8b   :  { %154 = vst.msk [vmem:[#allocation2 + $0x30] sm:$0xff] %vm147_vm1, %v121_v31 }
  0x8c   :  { %v1936_v16 = vpop.eup %1935  ;;  %158 = vst.msk [vmem:[#allocation2 + $0x50] sm:$0xff] %vm147_vm1, %v125_v8  ;;  %v1804_v18 = vmul.f32 -1.442695, %v239_v11  ;;  %v2391_v33 = vpop.permute.xlu1 %309 }
  0x8d   :  { %v251_v36 = vadd.f32 1.0, %v1936_v16  ;;  %162 = vst.msk [vmem:[#allocation2 + $0x70] sm:$0xff] %vm147_vm1, %v129_v10  ;;  %189 = vperm.xlu1 %1924, %v2249_v6   ;;  %v2385_v10 = vpop.permute.xlu0 %307 }
  0x8e   :  { %166 = vst.msk [vmem:[#allocation2 + $0x90] sm:$0xff] %vm147_vm1, %v133_v34  ;;  %1937 = vpow2.f32 %v1804_v18  ;;  %v415_v18 = vld [vmem:[#allocation2 + $0x20] sm:$0xff] }
  0x8f   :  { %1939 = vrcp.f32 %v251_v36  ;;  %170 = vst.msk [vmem:[#allocation2 + $0xb0] sm:$0xff] %vm147_vm1, %v137_v12  ;;  %vm259_vm3 = vweird.f32 %v251_v36  ;;  %v263_v55 = vand.u32 2147483647, %v251_v36  ;;  %v265_v56 = vand.u32 2147483648, %v251_v36 }
  0x90   :  { %174 = vst.msk [vmem:[#allocation2 + $0xd0] sm:$0xff] %vm147_vm1, %v141_v35  ;;  %v232_v20 = vpop.f32.mrf.mxu0 }
  0x91   :  { %178 = vst.msk [vmem:[#allocation2 + $0xf0] sm:$0xff] %vm147_vm1, %v145_v37  ;;  %v198_v47 = vld [vmem:[#allocation2 + $0x10] sm:$0xff]  ;;  %v266_v3 = vor.u32 1.1754944e-38, %v265_v56  ;;  %vm264_vm8 = vcmp.eq.f32.partialorder %v263_v55, 8.507059e+37 }
  0x92   :  { %v240_v51 = vadd.f32 %v232_v20, %v198_v47  ;;  %v2397_v34 = vpop.permute.xlu2 %311 }
  0x94   :  { %v1938_v38 = vpop.eup %1937 }
  0x95   :  { %v1940_v39 = vpop.eup %1939  ;;  %v252_v40 = vadd.f32 1.0, %v1938_v38 }
  0x96   :  { %v255_v41 = vmul.f32 %v1940_v39, %v251_v36  ;;  %vm260_vm2 = vweird.f32 %v1940_v39 }
  0x97   :  { %1941 = vrcp.f32 %v252_v40  ;;  %v280_v54 = vand.u32 2147483648, %v252_v40  ;;  %v278_v58 = vand.u32 2147483647, %v252_v40  ;;  %vm2365_vm5 = vmor %vm259_vm3, %vm260_vm2  ;;  %vm274_vm6 = vweird.f32 %v252_v40 }
  0x98   :  { %v256_v42 = vsub.f32 1.0, %v255_v41  ;;  %v235_v44 = vpop.f32.mrf.mxu0 }
  0x99   :  { %v241_v45 = vadd.f32 %v235_v44, %v199_v43  ;;  %v281_v1 = vor.u32 1.1754944e-38, %v280_v54  ;;  %vm279_vm9 = vcmp.eq.f32.partialorder %v278_v58, 8.507059e+37  ;;  %v416_v44 = vld [vmem:[#allocation2 + $0x28] sm:$0xff] }
  0x9a   :  { %v257_v48 = vmul.f32 %v1940_v39, %v256_v42 }
  0x9b   :  { %v1805_v46 = vmul.f32 -1.442695, %v241_v45 }
  0x9c   :  { %v258_v53 = vadd.f32 %v1940_v39, %v257_v48 }
  0x9d   :  { %v1942_v49 = vpop.eup %1941  ;;  %1943 = vpow2.f32 %v1805_v46 }
  0x9e   :  { %v270_v50 = vmul.f32 %v1942_v49, %v252_v40  ;;  %vm275_vm4 = vweird.f32 %v1942_v49  ;;  %1945 = vtanh.f32 %v240_v51  ;;  %v262_v62 = vsel %vm2365_vm5, %v1940_v39, %v258_v53 }
  0x9f   :  { %vm276_vm7 = vmor %vm274_vm6, %vm275_vm4  ;;  %v267_v13 = vsel %vm264_vm8, %v266_v3, %v262_v62 }
  0xa0   :  { %v271_v52 = vsub.f32 1.0, %v270_v50 }
  0xa2   :  { %v272_v57 = vmul.f32 %v1942_v49, %v271_v52 }
  0xa3   :  { %v1944_v59 = vpop.eup %1943 }
  0xa4   :  { %v273_v63 = vadd.f32 %v1942_v49, %v272_v57  ;;  %v253_v0 = vadd.f32 1.0, %v1944_v59  ;;  %v1946_v17 = vpop.eup %1945 }
  0xa5   :  { %v301_v19 = vmul.f32 %v1946_v17, %v267_v13 }
  0xa6   :  { %v277_v7 = vsel %vm276_vm7, %v1942_v49, %v273_v63  ;;  %1947 = vrcp.f32 %v253_v0  ;;  %v295_v25 = vand.u32 2147483648, %v253_v0  ;;  %v293_v27 = vand.u32 2147483647, %v253_v0 }
  0xa7   :  { %v282_v14 = vsel %vm279_vm9, %v281_v1, %v277_v7  ;;  %vm289_vm11 = vweird.f32 %v253_v0 }
  0xa8   :  { %v300_v15 = vmul.f32 0.0, %v282_v14  ;;  %v296_v29 = vor.u32 1.1754944e-38, %v295_v25  ;;  %vm294_vm13 = vcmp.eq.f32.partialorder %v293_v27, 8.507059e+37 }
  0xaa   :  { %v2375_v22 = vadd.f32 %v301_v19, %v300_v15 }
  0xac   :  { %v1948_v21 = vpop.eup %1947  ;;  %1949 = vtanh.f32 %v2375_v22 }
  0xad   :  { %v285_v23 = vmul.f32 %v1948_v21, %v253_v0  ;;  %vm290_vm10 = vweird.f32 %v1948_v21 }
  0xae   :  { %vm291_vm12 = vmor %vm289_vm11, %vm290_vm10 }
  0xaf   :  { %v286_v24 = vsub.f32 1.0, %v285_v23 }
  0xb1   :  { %v287_v26 = vmul.f32 %v1948_v21, %v286_v24 }
  0xb2   :  { %v1950_v31 = vpop.eup %1949 }
  0xb3   :  { %v288_v28 = vadd.f32 %v1948_v21, %v287_v26 }
  0xb5   :  { %v292_v30 = vsel %vm291_vm12, %v1948_v21, %v288_v28  ;;  %v418_v21 = vld [vmem:[#allocation2 + $0x38] sm:$0xff] }
  0xb6   :  { %v297_v8 = vsel %vm294_vm13, %v296_v29, %v292_v30 }
  0xb7   :  { %v304_v9 = vmul.f32 %v1950_v31, %v297_v8 }
  0xb9   :  { %337 = vmatpush.msra.mxu1 %v304_v9  ;;  %434 = vmatpush.msra.mxu2 %v304_v9 }
  0xba   :  { %1806 = vmatmul.msk.f32.vlgmr.msra.gmra.mxu1 %vm313_vm14, %v2379_v32  ;;  %1813 = vmatmul.msk.f32.vlgmr.msra.gmra.mxu2 %vm200_vm0, %v2224_v2 }
  0xc2   :  { %1807 = vmatmul.msk.f32.gmra.mxu1 %vm313_vm14, %v2385_v10  ;;  %1814 = vmatmul.msk.f32.gmra.mxu2 %vm200_vm0, %v2239_v5 }
  0xca   :  { %1808 = vmatmul.msk.f32.gmra.mxu1 %vm313_vm14, %v2391_v33  ;;  %1815 = vmatmul.msk.f32.gmra.mxu2 %vm200_vm0, %v2249_v6 }
  0xd2   :  { %1809 = vmatmul.msk.f32.gmra.mxu1 %vm313_vm14, %v2397_v34  ;;  %1816 = vmatmul.msk.f32.gmra.mxu2 %vm200_vm0, %v2230_v4 }
  0xe4   :  { %v2415_v56 = vpop.permute.xlu2 %193 }
  0xf7   :  { %v2403_v11 = vpop.permute.xlu0 %181  ;;  %v2406_v37 = vpop.permute.xlu1 %185 }
  0xff   :  { %v2424_v0 = vpop.permute.xlu1 %189 }
 0x137   :  { %v339_v12 = vpop.f32.mrf.mxu1 }
 0x138   :  { %v340_v16 = vadd.f32 %v339_v12, %v2403_v11  ;;  %v417_v12 = vld [vmem:[#allocation2 + $0x30] sm:$0xff] }
 0x13a   :  { %v1810_v35 = vmul.f32 -1.442695, %v340_v16 }
 0x13c   :  { %1951 = vpow2.f32 %v1810_v35 }
 0x13d   :  { %v436_v36 = vpop.f32.mrf.mxu2 }
 0x13e   :  { %v448_v20 = vadd.f32 %v436_v36, %v415_v18 }
 0x13f   :  { %v342_v38 = vpop.f32.mrf.mxu1 }
 0x140   :  { %v1817_v39 = vmul.f32 -1.442695, %v448_v20  ;;  %v343_v40 = vadd.f32 %v342_v38, %v2406_v37 }
 0x142   :  { %v1952_v41 = vpop.eup %1951  ;;  %1953 = vpow2.f32 %v1817_v39  ;;  %v1811_v42 = vmul.f32 -1.442695, %v343_v40 }
 0x143   :  { %v360_v43 = vadd.f32 1.0, %v1952_v41 }
 0x144   :  { %1955 = vpow2.f32 %v1811_v42 }
 0x145   :  { %1957 = vrcp.f32 %v360_v43  ;;  %v439_v45 = vpop.f32.mrf.mxu2  ;;  %v374_v13 = vand.u32 2147483648, %v360_v43  ;;  %v372_v15 = vand.u32 2147483647, %v360_v43  ;;  %vm368_vm15 = vweird.f32 %v360_v43 }
 0x146   :  { %v449_v46 = vadd.f32 %v439_v45, %v416_v44 }
 0x147   :  { %v345_v47 = vpop.f32.mrf.mxu1  ;;  %v375_v26 = vor.u32 1.1754944e-38, %v374_v13  ;;  %vm2431_vm2 = vcmp.eq.f32.partialorder %v372_v15, 8.507059e+37 }
 0x148   :  { %v1954_v48 = vpop.eup %1953  ;;  %v1818_v49 = vmul.f32 -1.442695, %v449_v46  ;;  %v346_v19 = vadd.f32 %v345_v47, %v2424_v0 }
 0x149   :  { %v2409_v50 = vadd.f32 1.0, %v1954_v48 }
 0x14a   :  { %v1956_v51 = vpop.eup %1955  ;;  %1959 = vpow2.f32 %v1818_v49 }
 0x14b   :  { %v2411_v52 = vpop.eup %1957  ;;  %1961 = vrcp.f32 %v2409_v50  ;;  %v361_v53 = vadd.f32 1.0, %v1956_v51  ;;  %v475_v35 = vand.u32 2147483648, %v2409_v50  ;;  %vm469_vm10 = vweird.f32 %v2409_v50 }
 0x14c   :  { %v364_v54 = vmul.f32 %v2411_v52, %v360_v43  ;;  %vm369_vm1 = vweird.f32 %v2411_v52 }
 0x14d   :  { %1963 = vrcp.f32 %v361_v53  ;;  %v442_v55 = vpop.f32.mrf.mxu2  ;;  %v389_v27 = vand.u32 2147483648, %v361_v53  ;;  %v387_v8 = vand.u32 2147483647, %v361_v53  ;;  %vm383_vm4 = vweird.f32 %v361_v53  ;;  %vm2441_vm5 = vmor %vm368_vm15, %vm369_vm1 }
 0x14e   :  { %v365_v57 = vsub.f32 1.0, %v364_v54  ;;  %v450_v20 = vadd.f32 %v442_v55, %v417_v12 }
 0x14f   :  { %v348_v58 = vpop.f32.mrf.mxu1  ;;  %v390_v42 = vor.u32 1.1754944e-38, %v389_v27  ;;  %vm388_vm8 = vcmp.eq.f32.partialorder %v387_v8, 8.507059e+37 }
 0x150   :  { %v1960_v59 = vpop.eup %1959  ;;  %v349_v60 = vadd.f32 %v348_v58, %v2415_v56  ;;  %v366_v7 = vmul.f32 %v2411_v52, %v365_v57 }
 0x151   :  { %v2418_v61 = vpop.eup %1961  ;;  %v2420_v62 = vadd.f32 1.0, %v1960_v59 }
 0x152   :  { %v465_v63 = vmul.f32 %v2418_v61, %v2409_v50  ;;  %v1812_v1 = vmul.f32 -1.442695, %v349_v60  ;;  %v367_v28 = vadd.f32 %v2411_v52, %v366_v7  ;;  %vm470_vm6 = vweird.f32 %v2418_v61 }
 0x153   :  { %v1964_v3 = vpop.eup %1963  ;;  %1965 = vrcp.f32 %v2420_v62  ;;  %v490_v45 = vand.u32 2147483648, %v2420_v62  ;;  %v488_v46 = vand.u32 2147483647, %v2420_v62  ;;  %vm484_vm11 = vweird.f32 %v2420_v62  ;;  %vm2459_vm12 = vmor %vm469_vm10, %vm470_vm6 }
 0x154   :  { %v379_v14 = vmul.f32 %v1964_v3, %v361_v53  ;;  %1967 = vpow2.f32 %v1812_v1  ;;  %v466_v17 = vsub.f32 1.0, %v465_v63  ;;  %vm384_vm3 = vweird.f32 %v1964_v3 }
 0x155   :  { %v445_v23 = vpop.f32.mrf.mxu2  ;;  %1969 = vtanh.f32 %v346_v19  ;;  %v371_v40 = vsel %vm2441_vm5, %v2411_v52, %v367_v28  ;;  %vm385_vm7 = vmor %vm383_vm4, %vm384_vm3  ;;  %v473_v53 = vand.u32 2147483647, %v2409_v50  ;;  %v491_v59 = vor.u32 1.1754944e-38, %v490_v45 }
 0x156   :  { %v380_v24 = vsub.f32 1.0, %v379_v14  ;;  %v451_v25 = vadd.f32 %v445_v23, %v418_v21  ;;  %v467_v16 = vmul.f32 %v2418_v61, %v466_v17  ;;  %v376_v49 = vsel %vm2431_vm2, %v375_v26, %v371_v40 }
 0x157   :  { %v476_v1 = vor.u32 1.1754944e-38, %v475_v35  ;;  %vm489_vm15 = vcmp.eq.f32.partialorder %v488_v46, 8.507059e+37  ;;  %vm474_vm1 = vcmp.eq.f32.partialorder %v473_v53, 8.507059e+37  ;;  %v609_v46 = vld [vmem:[#allocation2 + $0x48] sm:$0xff] }
 0x158   :  { %v381_v29 = vmul.f32 %v1964_v3, %v380_v24  ;;  %v1819_v30 = vmul.f32 -1.442695, %v451_v25  ;;  %v468_v43 = vadd.f32 %v2418_v61, %v467_v16 }
 0x159   :  { %v1966_v9 = vpop.eup %1965 }
 0x15a   :  { %v1968_v18 = vpop.eup %1967  ;;  %v480_v36 = vmul.f32 %v1966_v9, %v2420_v62  ;;  %1971 = vpow2.f32 %v1819_v30  ;;  %v382_v41 = vadd.f32 %v1964_v3, %v381_v29  ;;  %vm485_vm9 = vweird.f32 %v1966_v9 }
 0x15b   :  { %v362_v39 = vadd.f32 1.0, %v1968_v18  ;;  %v1970_v52 = vpop.eup %1969  ;;  %vm486_vm13 = vmor %vm484_vm11, %vm485_vm9  ;;  %v472_v60 = vsel %vm2459_vm12, %v2418_v61, %v468_v43 }
 0x15c   :  { %v481_v44 = vsub.f32 1.0, %v480_v36  ;;  %v386_v47 = vsel %vm385_vm7, %v1964_v3, %v382_v41  ;;  %v410_v50 = vmul.f32 %v1970_v52, %v376_v49  ;;  %v477_v14 = vsel %vm474_vm1, %v476_v1, %v472_v60 }
 0x15d   :  { %1973 = vrcp.f32 %v362_v39  ;;  %v391_v51 = vsel %vm388_vm8, %v390_v42, %v386_v47  ;;  %v404_v24 = vand.u32 2147483648, %v362_v39  ;;  %v402_v25 = vand.u32 2147483647, %v362_v39  ;;  %v608_v42 = vld [vmem:[#allocation2 + $0x40] sm:$0xff] }
 0x15e   :  { %v482_v48 = vmul.f32 %v1966_v9, %v481_v44  ;;  %v409_v54 = vmul.f32 0.0, %v391_v51  ;;  %1975 = vtanh.f32 %v450_v20  ;;  %vm398_vm3 = vweird.f32 %v362_v39 }
 0x15f   :  { %v405_v30 = vor.u32 1.1754944e-38, %v404_v24  ;;  %vm403_vm5 = vcmp.eq.f32.partialorder %v402_v25, 8.507059e+37  ;;  %v610_v25 = vld [vmem:[#allocation2 + $0x50] sm:$0xff] }
 0x160   :  { %v1972_v55 = vpop.eup %1971  ;;  %v483_v58 = vadd.f32 %v1966_v9, %v482_v48  ;;  %v2466_v13 = vadd.f32 %v410_v50, %v409_v54 }
 0x161   :  { %v463_v63 = vadd.f32 1.0, %v1972_v55 }
 0x162   :  { %v487_v3 = vsel %vm486_vm13, %v1966_v9, %v483_v58 }
 0x163   :  { %v1974_v62 = vpop.eup %1973  ;;  %v492_v7 = vsel %vm489_vm15, %v491_v59, %v487_v3  ;;  %1977 = vrcp.f32 %v463_v63  ;;  %v505_v12 = vand.u32 2147483648, %v463_v63  ;;  %v503_v18 = vand.u32 2147483647, %v463_v63  ;;  %v611_v3 = vld [vmem:[#allocation2 + $0x58] sm:$0xff] }
 0x164   :  { %v394_v15 = vmul.f32 %v1974_v62, %v362_v39  ;;  %v510_v17 = vmul.f32 %v492_v7, %v2375_v22  ;;  %v1976_v19 = vpop.eup %1975  ;;  %1979 = vtanh.f32 %v2466_v13  ;;  %vm399_vm2 = vweird.f32 %v1974_v62 }
 0x165   :  { %v511_v23 = vmul.f32 %v1976_v19, %v477_v14  ;;  %vm400_vm4 = vmor %vm398_vm3, %vm399_vm2  ;;  %vm499_vm7 = vweird.f32 %v463_v63  ;;  %v506_v20 = vor.u32 1.1754944e-38, %v505_v12  ;;  %vm504_vm9 = vcmp.eq.f32.partialorder %v503_v18, 8.507059e+37 }
 0x166   :  { %v395_v21 = vsub.f32 1.0, %v394_v15 }
 0x167   :  { %v2470_v27 = vadd.f32 %v511_v23, %v510_v17 }
 0x168   :  { %v396_v61 = vmul.f32 %v1974_v62, %v395_v21 }
 0x169   :  { %v1978_v26 = vpop.eup %1977  ;;  %1981 = vtanh.f32 %v2470_v27 }
 0x16a   :  { %v397_v28 = vadd.f32 %v1974_v62, %v396_v61  ;;  %v495_v29 = vmul.f32 %v1978_v26, %v463_v63  ;;  %v1980_v8 = vpop.eup %1979  ;;  %vm500_vm6 = vweird.f32 %v1978_v26 }
 0x16b   :  { %vm501_vm8 = vmor %vm499_vm7, %vm500_vm6 }
 0x16c   :  { %v401_v31 = vsel %vm400_vm4, %v1974_v62, %v397_v28  ;;  %v496_v22 = vsub.f32 1.0, %v495_v29 }
 0x16d   :  { %v406_v9 = vsel %vm403_vm5, %v405_v30, %v401_v31 }
 0x16e   :  { %v413_v16 = vmul.f32 %v1980_v8, %v406_v9  ;;  %v497_v35 = vmul.f32 %v1978_v26, %v496_v22 }
 0x16f   :  { %v1982_v39 = vpop.eup %1981 }
 0x170   :  { %529 = vmatpush.msra.mxu3 %v413_v16  ;;  %v498_v36 = vadd.f32 %v1978_v26, %v497_v35 }
 0x172   :  { %v502_v38 = vsel %vm501_vm8, %v1978_v26, %v498_v36 }
 0x173   :  { %v507_v40 = vsel %vm504_vm9, %v506_v20, %v502_v38 }
 0x174   :  { %v514_v41 = vmul.f32 %v1982_v39, %v507_v40 }
 0x176   :  { %530 = vmatpush.msra.mxu3 %v514_v41  ;;  %627 = vmatpush.msrb.mxu0 %v514_v41 }
 0x177   :  { %1820 = vmatmul.msk.f32.vlgmr.msra.gmra.mxu3 %vm313_vm14, %v2379_v32  ;;  %1827 = vmatmul.msk.f32.vlgmr.msrb.gmra.mxu0 %vm200_vm0, %v2224_v2 }
 0x17f   :  { %1821 = vmatmul.msk.f32.gmra.mxu3 %vm313_vm14, %v2385_v10  ;;  %1828 = vmatmul.msk.f32.gmra.mxu0 %vm200_vm0, %v2239_v5 }
 0x187   :  { %1822 = vmatmul.msk.f32.gmra.mxu3 %vm313_vm14, %v2391_v33  ;;  %1829 = vmatmul.msk.f32.gmra.mxu0 %vm200_vm0, %v2249_v6 }
 0x18f   :  { %1823 = vmatmul.msk.f32.gmra.mxu3 %vm313_vm14, %v2397_v34  ;;  %1830 = vmatmul.msk.f32.gmra.mxu0 %vm200_vm0, %v2230_v4 }
 0x1f4   :  { %v629_v2 = vpop.f32.mrf.mxu0 }
 0x1f5   :  { %v641_v44 = vadd.f32 %v629_v2, %v608_v42 }
 0x1f7   :  { %v1831_v45 = vmul.f32 -1.442695, %v641_v44 }
 0x1f9   :  { %1983 = vpow2.f32 %v1831_v45 }
 0x1fa   :  { %v532_v43 = vpop.f32.mrf.mxu3 }
 0x1fb   :  { %v533_v5 = vadd.f32 %v532_v43, %v2403_v11 }
 0x1fc   :  { %v632_v47 = vpop.f32.mrf.mxu0 }
 0x1fd   :  { %v1824_v48 = vmul.f32 -1.442695, %v533_v5  ;;  %v642_v49 = vadd.f32 %v632_v47, %v609_v46 }
 0x1ff   :  { %v1984_v51 = vpop.eup %1983  ;;  %1985 = vpow2.f32 %v1824_v48  ;;  %v1832_v6 = vmul.f32 -1.442695, %v642_v49 }
 0x200   :  { %v654_v52 = vadd.f32 1.0, %v1984_v51 }
 0x201   :  { %1987 = vpow2.f32 %v1832_v6 }
 0x202   :  { %1989 = vrcp.f32 %v654_v52  ;;  %v535_v53 = vpop.f32.mrf.mxu3  ;;  %v666_v29 = vand.u32 2147483647, %v654_v52  ;;  %v668_v30 = vand.u32 2147483648, %v654_v52  ;;  %vm662_vm12 = vweird.f32 %v654_v52 }
 0x203   :  { %v536_v4 = vadd.f32 %v535_v53, %v2406_v37 }
 0x204   :  { %v635_v54 = vpop.f32.mrf.mxu0  ;;  %vm2508_vm13 = vcmp.eq.f32.partialorder %v666_v29, 8.507059e+37  ;;  %v669_v39 = vor.u32 1.1754944e-38, %v668_v30 }
 0x205   :  { %v1986_v55 = vpop.eup %1985  ;;  %v1825_v57 = vmul.f32 -1.442695, %v536_v4  ;;  %v643_v28 = vadd.f32 %v635_v54, %v610_v25 }
 0x206   :  { %v2491_v58 = vadd.f32 1.0, %v1986_v55 }
 0x207   :  { %v1988_v59 = vpop.eup %1987  ;;  %1991 = vpow2.f32 %v1825_v57 }
 0x208   :  { %v2493_v60 = vpop.eup %1989  ;;  %1993 = vrcp.f32 %v2491_v58  ;;  %v655_v63 = vadd.f32 1.0, %v1988_v59  ;;  %vm561_vm6 = vweird.f32 %v2491_v58  ;;  %v567_v55 = vand.u32 2147483648, %v2491_v58 }
 0x209   :  { %v658_v50 = vmul.f32 %v2493_v60, %v654_v52  ;;  %vm663_vm10 = vweird.f32 %v2493_v60 }
 0x20a   :  { %1995 = vrcp.f32 %v655_v63  ;;  %v538_v1 = vpop.f32.mrf.mxu3  ;;  %v683_v12 = vand.u32 2147483648, %v655_v63  ;;  %v681_v16 = vand.u32 2147483647, %v655_v63  ;;  %vm677_vm15 = vweird.f32 %v655_v63  ;;  %vm2513_vm1 = vmor %vm662_vm12, %vm663_vm10 }
 0x20b   :  { %v659_v14 = vsub.f32 1.0, %v658_v50  ;;  %v539_v43 = vadd.f32 %v538_v1, %v2424_v0 }
 0x20c   :  { %v638_v62 = vpop.f32.mrf.mxu0  ;;  %v684_v45 = vor.u32 1.1754944e-38, %v683_v12  ;;  %vm682_vm3 = vcmp.eq.f32.partialorder %v681_v16, 8.507059e+37 }
 0x20d   :  { %v1992_v7 = vpop.eup %1991  ;;  %v644_v15 = vadd.f32 %v638_v62, %v611_v3  ;;  %v660_v26 = vmul.f32 %v2493_v60, %v659_v14 }
 0x20e   :  { %v2497_v17 = vpop.eup %1993  ;;  %v2499_v19 = vadd.f32 1.0, %v1992_v7 }
 0x20f   :  { %v557_v21 = vmul.f32 %v2497_v17, %v2491_v58  ;;  %v1833_v23 = vmul.f32 -1.442695, %v644_v15  ;;  %v661_v18 = vadd.f32 %v2493_v60, %v660_v26  ;;  %vm562_vm4 = vweird.f32 %v2497_v17 }
 0x210   :  { %v1996_v24 = vpop.eup %1995  ;;  %1997 = vrcp.f32 %v2499_v19  ;;  %v582_v49 = vand.u32 2147483648, %v2499_v19  ;;  %v580_v6 = vand.u32 2147483647, %v2499_v19  ;;  %vm576_vm7 = vweird.f32 %v2499_v19  ;;  %vm2532_vm8 = vmor %vm561_vm6, %vm562_vm4 }
 0x211   :  { %v673_v61 = vmul.f32 %v1996_v24, %v655_v63  ;;  %1999 = vpow2.f32 %v1833_v23  ;;  %v558_v22 = vsub.f32 1.0, %v557_v21  ;;  %vm678_vm11 = vweird.f32 %v1996_v24 }
 0x212   :  { %v541_v31 = vpop.f32.mrf.mxu3  ;;  %2001 = vtanh.f32 %v643_v28  ;;  %vm679_vm2 = vmor %vm677_vm15, %vm678_vm11  ;;  %v665_v46 = vsel %vm2513_vm1, %v2493_v60, %v661_v18  ;;  %v565_v60 = vand.u32 2147483647, %v2491_v58  ;;  %v583_v1 = vor.u32 1.1754944e-38, %v582_v49 }
 0x213   :  { %v674_v8 = vsub.f32 1.0, %v673_v61  ;;  %v542_v9 = vadd.f32 %v541_v31, %v2415_v56  ;;  %v559_v2 = vmul.f32 %v2497_v17, %v558_v22  ;;  %v670_v54 = vsel %vm2508_vm13, %v669_v39, %v665_v46  ;;  %v2577_v46 = vld [vmem:[%s2974_s1 + $0x18] sm:$0xff] }
 0x214   :  { %vm581_vm10 = vcmp.eq.f32.partialorder %v580_v6, 8.507059e+37  ;;  %vm566_vm11 = vcmp.eq.f32.partialorder %v565_v60, 8.507059e+37 }
 0x215   :  { %v675_v35 = vmul.f32 %v1996_v24, %v674_v8  ;;  %v1826_v36 = vmul.f32 -1.442695, %v542_v9  ;;  %v560_v53 = vadd.f32 %v2497_v17, %v559_v2 }
 0x216   :  { %v1998_v20 = vpop.eup %1997 }
 0x217   :  { %v572_v40 = vmul.f32 %v1998_v20, %v2499_v19  ;;  %v676_v42 = vadd.f32 %v1996_v24, %v675_v35  ;;  %v2000_v44 = vpop.eup %1999  ;;  %2003 = vpow2.f32 %v1826_v36  ;;  %vm577_vm5 = vweird.f32 %v1998_v20 }
 0x218   :  { %v656_v48 = vadd.f32 1.0, %v2000_v44  ;;  %v2002_v4 = vpop.eup %2001  ;;  %vm578_vm9 = vmor %vm576_vm7, %vm577_vm5  ;;  %v564_v62 = vsel %vm2532_vm8, %v2497_v17, %v560_v53 }
 0x219   :  { %v573_v5 = vsub.f32 1.0, %v572_v40  ;;  %v680_v47 = vsel %vm679_vm2, %v1996_v24, %v676_v42  ;;  %v704_v3 = vmul.f32 %v2002_v4, %v670_v54  ;;  %v2550_v40 = vld [vmem:[%s2974_s1] sm:$0xff]  ;;  %v802_v4 = vld [vmem:[#allocation2 + $0x68] sm:$0xff] }
 0x21a   :  { %v685_v51 = vsel %vm682_vm3, %v684_v45, %v680_v47  ;;  %2005 = vrcp.f32 %v656_v48  ;;  %v698_v28 = vand.u32 2147483648, %v656_v48  ;;  %v696_v29 = vand.u32 2147483647, %v656_v48  ;;  %v801_v47 = vld [vmem:[#allocation2 + $0x60] sm:$0xff] }
 0x21b   :  { %v574_v52 = vmul.f32 %v1998_v20, %v573_v5  ;;  %v703_v57 = vmul.f32 %v685_v51, %v2470_v27  ;;  %2007 = vtanh.f32 %v539_v43  ;;  %v568_v27 = vor.u32 1.1754944e-38, %v567_v55  ;;  %v2559_v43 = vld [vmem:[%s2974_s1 + $0x8] sm:$0xff]  ;;  %v2568_v5 = vld [vmem:[%s2974_s1 + $0x10] sm:$0xff] }
 0x21c   :  { %vm692_vm13 = vweird.f32 %v656_v48  ;;  %v699_v9 = vor.u32 1.1754944e-38, %v698_v28  ;;  %vm697_vm1 = vcmp.eq.f32.partialorder %v696_v29, 8.507059e+37 }
 0x21d   :  { %v575_v63 = vadd.f32 %v1998_v20, %v574_v52  ;;  %v2004_v50 = vpop.eup %2003  ;;  %v2540_v21 = vadd.f32 %v704_v3, %v703_v57  ;;  %v569_v58 = vsel %vm566_vm11, %v568_v27, %v564_v62 }
 0x21e   :  { %v555_v14 = vadd.f32 1.0, %v2004_v50 }
 0x21f   :  { %v579_v7 = vsel %vm578_vm9, %v1998_v20, %v575_v63 }
 0x220   :  { %v584_v15 = vsel %vm581_vm10, %v583_v1, %v579_v7  ;;  %v2006_v19 = vpop.eup %2005  ;;  %2009 = vrcp.f32 %v555_v14  ;;  %v597_v18 = vand.u32 2147483648, %v555_v14  ;;  %v595_v38 = vand.u32 2147483647, %v555_v14 }
 0x221   :  { %v688_v23 = vmul.f32 %v2006_v19, %v656_v48  ;;  %v602_v24 = vmul.f32 %v584_v15, %v2466_v13  ;;  %v2008_v61 = vpop.eup %2007  ;;  %2011 = vtanh.f32 %v2540_v21  ;;  %vm693_vm12 = vweird.f32 %v2006_v19 }
 0x222   :  { %v603_v26 = vmul.f32 %v2008_v61, %v569_v58  ;;  %vm694_vm15 = vmor %vm692_vm13, %vm693_vm12  ;;  %vm591_vm3 = vweird.f32 %v555_v14  ;;  %v598_v41 = vor.u32 1.1754944e-38, %v597_v18  ;;  %vm596_vm5 = vcmp.eq.f32.partialorder %v595_v38, 8.507059e+37 }
 0x223   :  { %v689_v25 = vsub.f32 1.0, %v688_v23 }
 0x224   :  { %v2544_v31 = vadd.f32 %v603_v26, %v602_v24 }
 0x225   :  { %v690_v17 = vmul.f32 %v2006_v19, %v689_v25 }
 0x226   :  { %v2010_v30 = vpop.eup %2009  ;;  %2013 = vtanh.f32 %v2544_v31 }
 0x227   :  { %v691_v22 = vadd.f32 %v2006_v19, %v690_v17  ;;  %v587_v8 = vmul.f32 %v2010_v30, %v555_v14  ;;  %v2012_v16 = vpop.eup %2011  ;;  %vm592_vm2 = vweird.f32 %v2010_v30  ;;  %v804_v17 = vld [vmem:[#allocation2 + $0x78] sm:$0xff] }
 0x228   :  { %vm593_vm4 = vmor %vm591_vm3, %vm592_vm2 }
 0x229   :  { %v695_v12 = vsel %vm694_vm15, %v2006_v19, %v691_v22  ;;  %v588_v13 = vsub.f32 1.0, %v587_v8 }
 0x22a   :  { %v700_v35 = vsel %vm697_vm1, %v699_v9, %v695_v12 }
 0x22b   :  { %v707_v36 = vmul.f32 %v2012_v16, %v700_v35  ;;  %v589_v20 = vmul.f32 %v2010_v30, %v588_v13  ;;  %v803_v16 = vld [vmem:[#allocation2 + $0x70] sm:$0xff] }
 0x22c   :  { %v2014_v2 = vpop.eup %2013 }
 0x22d   :  { %820 = vmatpush.msrb.mxu2 %v707_v36  ;;  %v590_v39 = vadd.f32 %v2010_v30, %v589_v20 }
 0x22e   :  { %1841 = vmatmul.msk.f32.vlgmr.msrb.gmra.mxu2 %vm200_vm0, %v2550_v40 }
 0x22f   :  { %v594_v42 = vsel %vm593_vm4, %v2010_v30, %v590_v39 }
 0x230   :  { %v599_v44 = vsel %vm596_vm5, %v598_v41, %v594_v42 }
 0x231   :  { %v606_v45 = vmul.f32 %v2014_v2, %v599_v44 }
 0x233   :  { %722 = vmatpush.msrb.mxu1 %v606_v45 }
 0x235   :  { %723 = vmatpush.msrb.mxu1 %v707_v36 }
 0x236   :  { %1834 = vmatmul.msk.f32.vlgmr.msrb.gmra.mxu1 %vm313_vm14, %v2379_v32  ;;  %1842 = vmatmul.msk.f32.gmra.mxu2 %vm200_vm0, %v2559_v43 }
 0x23e   :  { %1835 = vmatmul.msk.f32.gmra.mxu1 %vm313_vm14, %v2385_v10  ;;  %1843 = vmatmul.msk.f32.gmra.mxu2 %vm200_vm0, %v2568_v5 }
 0x246   :  { %1836 = vmatmul.msk.f32.gmra.mxu1 %vm313_vm14, %v2391_v33  ;;  %1844 = vmatmul.msk.f32.gmra.mxu2 %vm200_vm0, %v2577_v46 }
 0x24e   :  { %1837 = vmatmul.msk.f32.gmra.mxu1 %vm313_vm14, %v2397_v34 }
 0x2b1   :  { %v822_v48 = vpop.f32.mrf.mxu2 }
 0x2b2   :  { %v834_v49 = vadd.f32 %v822_v48, %v801_v47 }
 0x2b3   :  { %v725_v51 = vpop.f32.mrf.mxu1 }
 0x2b4   :  { %v1845_v6 = vmul.f32 -1.442695, %v834_v49  ;;  %v726_v52 = vadd.f32 %v725_v51, %v2403_v11 }
 0x2b6   :  { %2015 = vpow2.f32 %v1845_v6  ;;  %v1838_v53 = vmul.f32 -1.442695, %v726_v52 }
 0x2b8   :  { %2017 = vpow2.f32 %v1838_v53 }
 0x2b9   :  { %v825_v54 = vpop.f32.mrf.mxu2 }
 0x2ba   :  { %v835_v55 = vadd.f32 %v825_v54, %v802_v4 }
 0x2bb   :  { %v728_v57 = vpop.f32.mrf.mxu1 }
 0x2bc   :  { %v2016_v59 = vpop.eup %2015  ;;  %v1846_v60 = vmul.f32 -1.442695, %v835_v55  ;;  %v729_v63 = vadd.f32 %v728_v57, %v2406_v37 }
 0x2bd   :  { %v847_v50 = vadd.f32 1.0, %v2016_v59  ;;  %v994_v59 = vld [vmem:[#allocation2 + $0x80] sm:$0xff] }
 0x2be   :  { %v2018_v1 = vpop.eup %2017  ;;  %2019 = vpow2.f32 %v1846_v60  ;;  %v1839_v3 = vmul.f32 -1.442695, %v729_v63 }
 0x2bf   :  { %2021 = vrcp.f32 %v847_v50  ;;  %v2585_v62 = vadd.f32 1.0, %v2018_v1  ;;  %v861_v29 = vand.u32 2147483648, %v847_v50  ;;  %v859_v9 = vand.u32 2147483647, %v847_v50 }
 0x2c0   :  { %2023 = vpow2.f32 %v1839_v3  ;;  %vm855_vm6 = vweird.f32 %v847_v50 }
 0x2c1   :  { %2025 = vrcp.f32 %v2585_v62  ;;  %v828_v7 = vpop.f32.mrf.mxu2  ;;  %vm754_vm7 = vweird.f32 %v2585_v62  ;;  %v758_v38 = vand.u32 2147483647, %v2585_v62  ;;  %v862_v41 = vor.u32 1.1754944e-38, %v861_v29 }
 0x2c2   :  { %v836_v36 = vadd.f32 %v828_v7, %v803_v16  ;;  %v760_v42 = vand.u32 2147483648, %v2585_v62  ;;  %vm2604_vm8 = vcmp.eq.f32.partialorder %v859_v9, 8.507059e+37 }
 0x2c3   :  { %v731_v14 = vpop.f32.mrf.mxu1 }
 0x2c4   :  { %v2020_v27 = vpop.eup %2019  ;;  %v732_v48 = vadd.f32 %v731_v14, %v2424_v0 }
 0x2c5   :  { %v2588_v15 = vpop.eup %2021  ;;  %v848_v19 = vadd.f32 1.0, %v2020_v27 }
 0x2c6   :  { %v2024_v58 = vpop.eup %2023  ;;  %v851_v23 = vmul.f32 %v2588_v15, %v847_v50  ;;  %vm856_vm9 = vweird.f32 %v2588_v15 }
 0x2c7   :  { %v2591_v24 = vpop.eup %2025  ;;  %2027 = vrcp.f32 %v848_v19  ;;  %v2593_v61 = vadd.f32 1.0, %v2024_v58  ;;  %v876_v51 = vand.u32 2147483648, %v848_v19  ;;  %v874_v6 = vand.u32 2147483647, %v848_v19  ;;  %vm2616_vm15 = vmor %vm855_vm6, %vm856_vm9 }
 0x2c8   :  { %v750_v25 = vmul.f32 %v2591_v24, %v2585_v62  ;;  %v852_v28 = vsub.f32 1.0, %v851_v23  ;;  %vm870_vm11 = vweird.f32 %v848_v19  ;;  %vm755_vm12 = vweird.f32 %v2591_v24 }
 0x2c9   :  { %2029 = vrcp.f32 %v2593_v61  ;;  %v831_v26 = vpop.f32.mrf.mxu2  ;;  %v775_v54 = vand.u32 2147483648, %v2593_v61  ;;  %v773_v55 = vand.u32 2147483647, %v2593_v61  ;;  %v877_v3 = vor.u32 1.1754944e-38, %v876_v51  ;;  %vm2629_vm4 = vmor %vm754_vm7, %vm755_vm12 }
 0x2ca   :  { %v837_v30 = vadd.f32 %v831_v26, %v804_v17  ;;  %v751_v8 = vsub.f32 1.0, %v750_v25  ;;  %v853_v20 = vmul.f32 %v2588_v15, %v852_v28  ;;  %vm769_vm2 = vweird.f32 %v2593_v61 }
 0x2cb   :  { %v734_v22 = vpop.f32.mrf.mxu1  ;;  %vm875_vm3 = vcmp.eq.f32.partialorder %v874_v6, 8.507059e+37  ;;  %v776_v23 = vor.u32 1.1754944e-38, %v775_v54  ;;  %vm774_vm6 = vcmp.eq.f32.partialorder %v773_v55, 8.507059e+37  ;;  %v761_v28 = vor.u32 1.1754944e-38, %v760_v42 }
 0x2cc   :  { %v735_v12 = vadd.f32 %v734_v22, %v2415_v56  ;;  %v1847_v35 = vmul.f32 -1.442695, %v837_v30  ;;  %v752_v49 = vmul.f32 %v2591_v24, %v751_v8  ;;  %v854_v4 = vadd.f32 %v2588_v15, %v853_v20 }
 0x2cd   :  { %v2028_v13 = vpop.eup %2027  ;;  %vm759_vm7 = vcmp.eq.f32.partialorder %v758_v38, 8.507059e+37 }
 0x2ce   :  { %v866_v18 = vmul.f32 %v2028_v13, %v848_v19  ;;  %2031 = vpow2.f32 %v1847_v35  ;;  %v1840_v2 = vmul.f32 -1.442695, %v735_v12  ;;  %vm871_vm10 = vweird.f32 %v2028_v13 }
 0x2cf   :  { %v2030_v39 = vpop.eup %2029  ;;  %v753_v63 = vadd.f32 %v2591_v24, %v752_v49  ;;  %vm872_vm1 = vmor %vm870_vm11, %vm871_vm10  ;;  %v858_v7 = vsel %vm2616_vm15, %v2588_v15, %v854_v4 }
 0x2d0   :  { %v867_v44 = vsub.f32 1.0, %v866_v18  ;;  %v765_v45 = vmul.f32 %v2030_v39, %v2593_v61  ;;  %2033 = vpow2.f32 %v1840_v2  ;;  %vm770_vm13 = vweird.f32 %v2030_v39 }
 0x2d1   :  { %2035 = vtanh.f32 %v836_v36  ;;  %vm771_vm5 = vmor %vm769_vm2, %vm770_vm13  ;;  %v757_v15 = vsel %vm2629_vm4, %v2591_v24, %v753_v63  ;;  %v863_v26 = vsel %vm2604_vm8, %v862_v41, %v858_v7 }
 0x2d2   :  { %v868_v52 = vmul.f32 %v2028_v13, %v867_v44  ;;  %v766_v53 = vsub.f32 1.0, %v765_v45  ;;  %2037 = vtanh.f32 %v732_v48  ;;  %v762_v22 = vsel %vm759_vm7, %v761_v28, %v757_v15 }
 0x2d4   :  { %v767_v57 = vmul.f32 %v2030_v39, %v766_v53  ;;  %v869_v60 = vadd.f32 %v2028_v13, %v868_v52  ;;  %v2032_v1 = vpop.eup %2031 }
 0x2d5   :  { %v849_v19 = vadd.f32 1.0, %v2032_v1 }
 0x2d6   :  { %v873_v14 = vsel %vm872_vm1, %v2028_v13, %v869_v60  ;;  %v768_v27 = vadd.f32 %v2030_v39, %v767_v57  ;;  %v2034_v58 = vpop.eup %2033 }
 0x2d7   :  { %v878_v61 = vsel %vm875_vm3, %v877_v3, %v873_v14  ;;  %2039 = vrcp.f32 %v849_v19  ;;  %v748_v62 = vadd.f32 1.0, %v2034_v58  ;;  %v2036_v30 = vpop.eup %2035  ;;  %v889_v41 = vand.u32 2147483647, %v849_v19  ;;  %v995_v3 = vld [vmem:[#allocation2 + $0x88] sm:$0xff] }
 0x2d8   :  { %v772_v25 = vsel %vm771_vm5, %v2030_v39, %v768_v27  ;;  %v896_v29 = vmul.f32 %v878_v61, %v2540_v21  ;;  %v897_v8 = vmul.f32 %v2036_v30, %v863_v26  ;;  %v2038_v12 = vpop.eup %2037  ;;  %v891_v21 = vand.u32 2147483648, %v849_v19 }
 0x2d9   :  { %v777_v17 = vsel %vm774_vm6, %v776_v23, %v772_v25  ;;  %2041 = vrcp.f32 %v748_v62  ;;  %v796_v16 = vmul.f32 %v2038_v12, %v762_v22  ;;  %vm885_vm9 = vweird.f32 %v849_v19  ;;  %v997_v12 = vld [vmem:[#allocation2 + $0x98] sm:$0xff] }
 0x2da   :  { %v795_v9 = vmul.f32 %v777_v17, %v2544_v31  ;;  %v2641_v24 = vadd.f32 %v897_v8, %v896_v29  ;;  %v790_v31 = vand.u32 2147483648, %v748_v62  ;;  %v788_v45 = vand.u32 2147483647, %v748_v62 }
 0x2db   :  { %v892_v47 = vor.u32 1.1754944e-38, %v891_v21  ;;  %vm890_vm12 = vcmp.eq.f32.partialorder %v889_v41, 8.507059e+37  ;;  %vm784_vm13 = vweird.f32 %v748_v62  ;;  %v996_v41 = vld [vmem:[#allocation2 + $0x90] sm:$0xff] }
 0x2dc   :  { %v2643_v36 = vadd.f32 %v796_v16, %v795_v9  ;;  %2043 = vtanh.f32 %v2641_v24  ;;  %v791_v52 = vor.u32 1.1754944e-38, %v790_v31  ;;  %vm789_vm1 = vcmp.eq.f32.partialorder %v788_v45, 8.507059e+37 }
 0x2dd   :  { %v2040_v13 = vpop.eup %2039 }
 0x2de   :  { %v881_v35 = vmul.f32 %v2040_v13, %v849_v19  ;;  %vm886_vm8 = vweird.f32 %v2040_v13  ;;  %2045 = vtanh.f32 %v2643_v36 }
 0x2df   :  { %v2042_v18 = vpop.eup %2041  ;;  %vm887_vm11 = vmor %vm885_vm9, %vm886_vm8 }
 0x2e0   :  { %v882_v20 = vsub.f32 1.0, %v881_v35  ;;  %v780_v39 = vmul.f32 %v2042_v18, %v748_v62  ;;  %vm785_vm10 = vweird.f32 %v2042_v18 }
 0x2e1   :  { %vm786_vm15 = vmor %vm784_vm13, %vm785_vm10 }
 0x2e2   :  { %v883_v38 = vmul.f32 %v2040_v13, %v882_v20  ;;  %v781_v42 = vsub.f32 1.0, %v780_v39  ;;  %v2044_v51 = vpop.eup %2043 }
 0x2e4   :  { %v884_v2 = vadd.f32 %v2040_v13, %v883_v38  ;;  %v782_v44 = vmul.f32 %v2042_v18, %v781_v42  ;;  %v2046_v54 = vpop.eup %2045 }
 0x2e6   :  { %v888_v48 = vsel %vm887_vm11, %v2040_v13, %v884_v2  ;;  %v783_v49 = vadd.f32 %v2042_v18, %v782_v44 }
 0x2e7   :  { %v893_v6 = vsel %vm890_vm12, %v892_v47, %v888_v48 }
 0x2e8   :  { %v900_v53 = vmul.f32 %v2044_v51, %v893_v6  ;;  %v787_v4 = vsel %vm786_vm15, %v2042_v18, %v783_v49 }
 0x2e9   :  { %v792_v55 = vsel %vm789_vm1, %v791_v52, %v787_v4 }
 0x2ea   :  { %1013 = vmatpush.msra.mxu0 %v900_v53  ;;  %v799_v57 = vmul.f32 %v2046_v54, %v792_v55 }
 0x2eb   :  { %1855 = vmatmul.msk.f32.vlgmr.msra.gmra.mxu0 %vm200_vm0, %v2550_v40 }
 0x2ec   :  { %915 = vmatpush.msrb.mxu3 %v799_v57 }
 0x2ee   :  { %916 = vmatpush.msrb.mxu3 %v900_v53 }
 0x2ef   :  { %1848 = vmatmul.msk.f32.vlgmr.msrb.gmra.mxu3 %vm313_vm14, %v2379_v32 }
 0x2f3   :  { %1856 = vmatmul.msk.f32.gmra.mxu0 %vm200_vm0, %v2559_v43 }
 0x2f7   :  { %1849 = vmatmul.msk.f32.gmra.mxu3 %vm313_vm14, %v2385_v10 }
 0x2fb   :  { %1857 = vmatmul.msk.f32.gmra.mxu0 %vm200_vm0, %v2568_v5 }
 0x2ff   :  { %1850 = vmatmul.msk.f32.gmra.mxu3 %vm313_vm14, %v2391_v33 }
 0x303   :  { %1858 = vmatmul.msk.f32.gmra.mxu0 %vm200_vm0, %v2577_v46 }
 0x307   :  { %1851 = vmatmul.msk.f32.gmra.mxu3 %vm313_vm14, %v2397_v34 }
 0x368   :  { %v1015_v60 = vpop.f32.mrf.mxu0 }
 0x369   :  { %v1027_v63 = vadd.f32 %v1015_v60, %v994_v59 }
 0x36b   :  { %v1859_v1 = vmul.f32 -1.442695, %v1027_v63 }
 0x36d   :  { %2047 = vpow2.f32 %v1859_v1 }
 0x370   :  { %v1018_v7 = vpop.f32.mrf.mxu0 }
 0x371   :  { %v1028_v14 = vadd.f32 %v1018_v7, %v995_v3 }
 0x372   :  { %v918_v50 = vpop.f32.mrf.mxu3 }
 0x373   :  { %v2048_v27 = vpop.eup %2047  ;;  %v1860_v19 = vmul.f32 -1.442695, %v1028_v14  ;;  %v919_v58 = vadd.f32 %v918_v50, %v2403_v11 }
 0x374   :  { %v1040_v23 = vadd.f32 1.0, %v2048_v27 }
 0x375   :  { %2049 = vpow2.f32 %v1860_v19  ;;  %v1852_v61 = vmul.f32 -1.442695, %v919_v58 }
 0x376   :  { %2051 = vrcp.f32 %v1040_v23  ;;  %v1054_v51 = vand.u32 2147483648, %v1040_v23  ;;  %vm1048_vm4 = vweird.f32 %v1040_v23  ;;  %v1052_v52 = vand.u32 2147483647, %v1040_v23 }
 0x377   :  { %2053 = vpow2.f32 %v1852_v61 }
 0x378   :  { %v1021_v15 = vpop.f32.mrf.mxu0  ;;  %v1055_v3 = vor.u32 1.1754944e-38, %v1054_v51  ;;  %vm1053_vm9 = vcmp.eq.f32.partialorder %v1052_v52, 8.507059e+37 }
 0x379   :  { %v1029_v31 = vadd.f32 %v1021_v15, %v996_v41 }
 0x37a   :  { %v921_v25 = vpop.f32.mrf.mxu3 }
 0x37b   :  { %v2050_v62 = vpop.eup %2049  ;;  %v922_v26 = vadd.f32 %v921_v25, %v2406_v37 }
 0x37c   :  { %v2052_v28 = vpop.eup %2051  ;;  %v1041_v17 = vadd.f32 1.0, %v2050_v62 }
 0x37d   :  { %v2054_v29 = vpop.eup %2053  ;;  %v1044_v30 = vmul.f32 %v2052_v28, %v1040_v23  ;;  %v1853_v22 = vmul.f32 -1.442695, %v922_v26  ;;  %vm1049_vm2 = vweird.f32 %v2052_v28 }
 0x37e   :  { %2055 = vrcp.f32 %v1041_v17  ;;  %v2665_v8 = vadd.f32 1.0, %v2054_v29  ;;  %v1069_v47 = vand.u32 2147483648, %v1041_v17  ;;  %v1067_v6 = vand.u32 2147483647, %v1041_v17  ;;  %vm2672_vm6 = vmor %vm1048_vm4, %vm1049_vm2 }
 0x37f   :  { %2057 = vpow2.f32 %v1853_v22  ;;  %v1045_v9 = vsub.f32 1.0, %v1044_v30  ;;  %vm1063_vm5 = vweird.f32 %v1041_v17 }
 0x380   :  { %2059 = vrcp.f32 %v2665_v8  ;;  %v1024_v13 = vpop.f32.mrf.mxu0  ;;  %v1070_v60 = vor.u32 1.1754944e-38, %v1069_v47  ;;  %vm1068_vm8 = vcmp.eq.f32.partialorder %v1067_v6, 8.507059e+37  ;;  %v951_v26 = vand.u32 2147483647, %v2665_v8 }
 0x381   :  { %v1030_v16 = vadd.f32 %v1024_v13, %v997_v12  ;;  %v1046_v39 = vmul.f32 %v2052_v28, %v1045_v9  ;;  %vm947_vm12 = vweird.f32 %v2665_v8 }
 0x382   :  { %v924_v35 = vpop.f32.mrf.mxu3  ;;  %vm952_vm2 = vcmp.eq.f32.partialorder %v951_v26, 8.507059e+37  ;;  %v1188_v26 = vld [vmem:[#allocation2 + $0xa8] sm:$0xff] }
 0x383   :  { %v1861_v18 = vmul.f32 -1.442695, %v1030_v16  ;;  %v1047_v48 = vadd.f32 %v2052_v28, %v1046_v39  ;;  %v925_v62 = vadd.f32 %v924_v35, %v2424_v0 }
 0x384   :  { %v2056_v20 = vpop.eup %2055 }
 0x385   :  { %v2058_v21 = vpop.eup %2057  ;;  %v1059_v38 = vmul.f32 %v2056_v20, %v1041_v17  ;;  %2061 = vpow2.f32 %v1861_v18  ;;  %vm1064_vm3 = vweird.f32 %v2056_v20  ;;  %v1051_v63 = vsel %vm2672_vm6, %v2052_v28, %v1047_v48 }
 0x386   :  { %v2668_v42 = vpop.eup %2059  ;;  %v940_v2 = vadd.f32 1.0, %v2058_v21  ;;  %vm1065_vm7 = vmor %vm1063_vm5, %vm1064_vm3  ;;  %v1056_v19 = vsel %vm1053_vm9, %v1055_v3, %v1051_v63 }
 0x387   :  { %v1060_v44 = vsub.f32 1.0, %v1059_v38  ;;  %v943_v45 = vmul.f32 %v2668_v42, %v2665_v8  ;;  %vm948_vm10 = vweird.f32 %v2668_v42 }
 0x388   :  { %2063 = vrcp.f32 %v940_v2  ;;  %v968_v17 = vand.u32 2147483648, %v940_v2  ;;  %v966_v29 = vand.u32 2147483647, %v940_v2  ;;  %vm962_vm13 = vweird.f32 %v940_v2  ;;  %vm2689_vm15 = vmor %vm947_vm12, %vm948_vm10 }
 0x389   :  { %v1061_v49 = vmul.f32 %v2056_v20, %v1060_v44  ;;  %2065 = vtanh.f32 %v1029_v31  ;;  %v944_v54 = vsub.f32 1.0, %v943_v45 }
 0x38a   :  { %v927_v53 = vpop.f32.mrf.mxu3  ;;  %vm967_vm3 = vcmp.eq.f32.partialorder %v966_v29, 8.507059e+37 }
 0x38b   :  { %v2062_v4 = vpop.eup %2061  ;;  %v1062_v57 = vadd.f32 %v2056_v20, %v1061_v49  ;;  %v928_v59 = vadd.f32 %v927_v53, %v2415_v56  ;;  %v945_v23 = vmul.f32 %v2668_v42, %v944_v54 }
 0x38c   :  { %v1042_v1 = vadd.f32 1.0, %v2062_v4 }
 0x38d   :  { %v1066_v7 = vsel %vm1065_vm7, %v2056_v20, %v1062_v57  ;;  %v1854_v14 = vmul.f32 -1.442695, %v928_v59  ;;  %v946_v22 = vadd.f32 %v2668_v42, %v945_v23  ;;  %v969_v20 = vor.u32 1.1754944e-38, %v968_v17 }
 0x38e   :  { %v2064_v50 = vpop.eup %2063  ;;  %v1071_v27 = vsel %vm1068_vm8, %v1070_v60, %v1066_v7  ;;  %2067 = vrcp.f32 %v1042_v1  ;;  %v1082_v45 = vand.u32 2147483647, %v1042_v1  ;;  %vm1078_vm5 = vweird.f32 %v1042_v1 }
 0x38f   :  { %v958_v58 = vmul.f32 %v2064_v50, %v940_v2  ;;  %v2066_v61 = vpop.eup %2065  ;;  %v1089_v15 = vmul.f32 %v1071_v27, %v2641_v24  ;;  %2069 = vpow2.f32 %v1854_v14  ;;  %vm963_vm11 = vweird.f32 %v2064_v50 }
 0x390   :  { %v1090_v28 = vmul.f32 %v2066_v61, %v1056_v19  ;;  %v953_v24 = vand.u32 2147483648, %v2665_v8  ;;  %vm964_vm1 = vmor %vm962_vm13, %vm963_vm11  ;;  %2071 = vtanh.f32 %v925_v62  ;;  %v950_v21 = vsel %vm2689_vm15, %v2668_v42, %v946_v22 }
 0x391   :  { %v959_v25 = vsub.f32 1.0, %v958_v58  ;;  %v1084_v2 = vand.u32 2147483648, %v1042_v1  ;;  %vm1083_vm7 = vcmp.eq.f32.partialorder %v1082_v45, 8.507059e+37  ;;  %v1187_v58 = vld [vmem:[#allocation2 + $0xa0] sm:$0xff] }
 0x392   :  { %v2685_v12 = vadd.f32 %v1090_v28, %v1089_v15  ;;  %v954_v41 = vor.u32 1.1754944e-38, %v953_v24 }
 0x393   :  { %v960_v30 = vmul.f32 %v2064_v50, %v959_v25  ;;  %v1085_v6 = vor.u32 1.1754944e-38, %v1084_v2  ;;  %v1190_v2 = vld [vmem:[#allocation2 + $0xb8] sm:$0xff] }
 0x394   :  { %v2068_v9 = vpop.eup %2067  ;;  %2073 = vtanh.f32 %v2685_v12  ;;  %v955_v47 = vsel %vm952_vm2, %v954_v41, %v950_v21 }
 0x395   :  { %v1074_v13 = vmul.f32 %v2068_v9, %v1042_v1  ;;  %v961_v35 = vadd.f32 %v2064_v50, %v960_v30  ;;  %v2070_v18 = vpop.eup %2069  ;;  %vm1079_vm4 = vweird.f32 %v2068_v9 }
 0x396   :  { %v941_v8 = vadd.f32 1.0, %v2070_v18  ;;  %v2072_v51 = vpop.eup %2071  ;;  %vm1080_vm6 = vmor %vm1078_vm5, %vm1079_vm4 }
 0x397   :  { %v1075_v39 = vsub.f32 1.0, %v1074_v13  ;;  %v965_v38 = vsel %vm964_vm1, %v2064_v50, %v961_v35  ;;  %v989_v42 = vmul.f32 %v2072_v51, %v955_v47 }
 0x398   :  { %v970_v31 = vsel %vm967_vm3, %v969_v20, %v965_v38  ;;  %2075 = vrcp.f32 %v941_v8  ;;  %v981_v1 = vand.u32 2147483647, %v941_v8  ;;  %vm977_vm9 = vweird.f32 %v941_v8 }
 0x399   :  { %v1076_v44 = vmul.f32 %v2068_v9, %v1075_v39  ;;  %v988_v48 = vmul.f32 %v970_v31, %v2643_v36  ;;  %v983_v36 = vand.u32 2147483648, %v941_v8 }
 0x39a   :  { %v2074_v53 = vpop.eup %2073  ;;  %vm982_vm11 = vcmp.eq.f32.partialorder %v981_v1, 8.507059e+37 }
 0x39b   :  { %v1077_v49 = vadd.f32 %v2068_v9, %v1076_v44  ;;  %v2698_v55 = vadd.f32 %v989_v42, %v988_v48  ;;  %v984_v7 = vor.u32 1.1754944e-38, %v983_v36 }
 0x39d   :  { %v1081_v52 = vsel %vm1080_vm6, %v2068_v9, %v1077_v49  ;;  %2077 = vtanh.f32 %v2698_v55 }
 0x39e   :  { %v1086_v4 = vsel %vm1083_vm7, %v1085_v6, %v1081_v52  ;;  %v2076_v54 = vpop.eup %2075 }
 0x39f   :  { %v1093_v57 = vmul.f32 %v2074_v53, %v1086_v4  ;;  %v973_v59 = vmul.f32 %v2076_v54, %v941_v8  ;;  %vm978_vm8 = vweird.f32 %v2076_v54  ;;  %v1189_v4 = vld [vmem:[#allocation2 + $0xb0] sm:$0xff] }
 0x3a0   :  { %vm979_vm10 = vmor %vm977_vm9, %vm978_vm8 }
 0x3a1   :  { %1206 = vmatpush.msra.mxu2 %v1093_v57  ;;  %v974_v60 = vsub.f32 1.0, %v973_v59 }
 0x3a2   :  { %1869 = vmatmul.msk.f32.vlgmr.msra.gmra.mxu2 %vm200_vm0, %v2550_v40 }
 0x3a3   :  { %v975_v63 = vmul.f32 %v2076_v54, %v974_v60  ;;  %v2078_v50 = vpop.eup %2077 }
 0x3a5   :  { %v976_v3 = vadd.f32 %v2076_v54, %v975_v63 }
 0x3a7   :  { %v980_v14 = vsel %vm979_vm10, %v2076_v54, %v976_v3 }
 0x3a8   :  { %v985_v27 = vsel %vm982_vm11, %v984_v7, %v980_v14 }
 0x3a9   :  { %v992_v19 = vmul.f32 %v2078_v50, %v985_v27 }
 0x3aa   :  { %1870 = vmatmul.msk.f32.gmra.mxu2 %vm200_vm0, %v2559_v43 }
 0x3ab   :  { %1108 = vmatpush.msra.mxu1 %v992_v19 }
 0x3ad   :  { %1109 = vmatpush.msra.mxu1 %v1093_v57 }
 0x3ae   :  { %1862 = vmatmul.msk.f32.vlgmr.msra.gmra.mxu1 %vm313_vm14, %v2379_v32 }
 0x3b2   :  { %1871 = vmatmul.msk.f32.gmra.mxu2 %vm200_vm0, %v2568_v5 }
 0x3b6   :  { %1863 = vmatmul.msk.f32.gmra.mxu1 %vm313_vm14, %v2385_v10 }
 0x3ba   :  { %1872 = vmatmul.msk.f32.gmra.mxu2 %vm200_vm0, %v2577_v46 }
 0x3be   :  { %1864 = vmatmul.msk.f32.gmra.mxu1 %vm313_vm14, %v2391_v33 }
 0x3c6   :  { %1865 = vmatmul.msk.f32.gmra.mxu1 %vm313_vm14, %v2397_v34 }
 0x425   :  { %v1208_v23 = vpop.f32.mrf.mxu2 }
 0x426   :  { %v1220_v61 = vadd.f32 %v1208_v23, %v1187_v58 }
 0x428   :  { %v1873_v15 = vmul.f32 -1.442695, %v1220_v61 }
 0x42a   :  { %2079 = vpow2.f32 %v1873_v15 }
 0x42b   :  { %v1111_v25 = vpop.f32.mrf.mxu1 }
 0x42c   :  { %v1112_v62 = vadd.f32 %v1111_v25, %v2403_v11 }
 0x42d   :  { %v1211_v28 = vpop.f32.mrf.mxu2 }
 0x42e   :  { %v1221_v17 = vadd.f32 %v1211_v28, %v1188_v26  ;;  %v1866_v29 = vmul.f32 -1.442695, %v1112_v62 }
 0x430   :  { %v2080_v30 = vpop.eup %2079  ;;  %v1874_v22 = vmul.f32 -1.442695, %v1221_v17  ;;  %2081 = vpow2.f32 %v1866_v29 }
 0x431   :  { %v1233_v9 = vadd.f32 1.0, %v2080_v30 }
 0x432   :  { %2083 = vpow2.f32 %v1874_v22 }
 0x433   :  { %2085 = vrcp.f32 %v1233_v9  ;;  %v1114_v24 = vpop.f32.mrf.mxu1  ;;  %v1245_v54 = vand.u32 2147483647, %v1233_v9  ;;  %v1247_v60 = vand.u32 2147483648, %v1233_v9  ;;  %vm1241_vm15 = vweird.f32 %v1233_v9 }
 0x434   :  { %v1115_v13 = vadd.f32 %v1114_v24, %v2406_v37 }
 0x435   :  { %v1214_v16 = vpop.f32.mrf.mxu2  ;;  %vm2730_vm1 = vcmp.eq.f32.partialorder %v1245_v54, 8.507059e+37  ;;  %v1248_v23 = vor.u32 1.1754944e-38, %v1247_v60 }
 0x436   :  { %v2082_v35 = vpop.eup %2081  ;;  %v1867_v18 = vmul.f32 -1.442695, %v1115_v13  ;;  %v1222_v59 = vadd.f32 %v1214_v16, %v1189_v4 }
 0x437   :  { %v2719_v39 = vadd.f32 1.0, %v2082_v35 }
 0x438   :  { %v2084_v20 = vpop.eup %2083  ;;  %2087 = vpow2.f32 %v1867_v18 }
 0x439   :  { %v2086_v21 = vpop.eup %2085  ;;  %v1234_v38 = vadd.f32 1.0, %v2084_v20  ;;  %2089 = vrcp.f32 %v2719_v39  ;;  %vm1140_vm8 = vweird.f32 %v2719_v39 }
 0x43a   :  { %v1237_v8 = vmul.f32 %v2086_v21, %v1233_v9  ;;  %vm1242_vm12 = vweird.f32 %v2086_v21 }
 0x43b   :  { %2091 = vrcp.f32 %v1234_v38  ;;  %v1117_v41 = vpop.f32.mrf.mxu1  ;;  %v1262_v1 = vand.u32 2147483648, %v1234_v38  ;;  %v1260_v14 = vand.u32 2147483647, %v1234_v38  ;;  %vm1256_vm2 = vweird.f32 %v1234_v38  ;;  %vm2734_vm3 = vmor %vm1241_vm15, %vm1242_vm12 }
 0x43c   :  { %v1238_v31 = vsub.f32 1.0, %v1237_v8  ;;  %v1118_v9 = vadd.f32 %v1117_v41, %v2424_v0 }
 0x43d   :  { %v1217_v44 = vpop.f32.mrf.mxu2  ;;  %v1263_v29 = vor.u32 1.1754944e-38, %v1262_v1  ;;  %vm1261_vm5 = vcmp.eq.f32.partialorder %v1260_v14, 8.507059e+37 }
 0x43e   :  { %v1223_v45 = vadd.f32 %v1217_v44, %v1190_v2  ;;  %v2088_v47 = vpop.eup %2087  ;;  %v1239_v52 = vmul.f32 %v2086_v21, %v1238_v31  ;;  %v1144_v2 = vand.u32 2147483647, %v2719_v39 }
 0x43f   :  { %v2722_v48 = vpop.eup %2089  ;;  %v2724_v49 = vadd.f32 1.0, %v2088_v47 }
 0x440   :  { %v1875_v51 = vmul.f32 -1.442695, %v1223_v45  ;;  %v1136_v42 = vmul.f32 %v2722_v48, %v2719_v39  ;;  %v1240_v3 = vadd.f32 %v2086_v21, %v1239_v52  ;;  %vm1141_vm6 = vweird.f32 %v2722_v48 }
 0x441   :  { %v2092_v6 = vpop.eup %2091  ;;  %2093 = vrcp.f32 %v2724_v49  ;;  %v1161_v13 = vand.u32 2147483648, %v2724_v49  ;;  %v1159_v18 = vand.u32 2147483647, %v2724_v49  ;;  %vm1155_vm9 = vweird.f32 %v2724_v49  ;;  %vm2761_vm10 = vmor %vm1140_vm8, %vm1141_vm6 }
 0x442   :  { %v1252_v53 = vmul.f32 %v2092_v6, %v1234_v38  ;;  %2095 = vpow2.f32 %v1875_v51  ;;  %v1137_v63 = vsub.f32 1.0, %v1136_v42  ;;  %vm1257_vm13 = vweird.f32 %v2092_v6 }
 0x443   :  { %v1120_v36 = vpop.f32.mrf.mxu1  ;;  %vm2738_vm4 = vmor %vm1256_vm2, %vm1257_vm13  ;;  %v1244_v26 = vsel %vm2734_vm3, %v2086_v21, %v1240_v3  ;;  %2097 = vtanh.f32 %v1222_v59  ;;  %v1146_v38 = vand.u32 2147483648, %v2719_v39  ;;  %v1162_v47 = vor.u32 1.1754944e-38, %v1161_v13 }
 0x444   :  { %v1253_v57 = vsub.f32 1.0, %v1252_v53  ;;  %v1121_v50 = vadd.f32 %v1120_v36, %v2415_v56  ;;  %v1138_v28 = vmul.f32 %v2722_v48, %v1137_v63  ;;  %v1249_v16 = vsel %vm2730_vm1, %v1248_v23, %v1244_v26 }
 0x445   :  { %vm1160_vm12 = vcmp.eq.f32.partialorder %v1159_v18, 8.507059e+37  ;;  %v1147_v42 = vor.u32 1.1754944e-38, %v1146_v38  ;;  %vm1145_vm13 = vcmp.eq.f32.partialorder %v1144_v2, 8.507059e+37 }
 0x446   :  { %v1254_v7 = vmul.f32 %v2092_v6, %v1253_v57  ;;  %v1868_v15 = vmul.f32 -1.442695, %v1121_v50  ;;  %v1139_v21 = vadd.f32 %v2722_v48, %v1138_v28 }
 0x447   :  { %v2094_v19 = vpop.eup %2093 }
 0x448   :  { %v1255_v61 = vadd.f32 %v2092_v6, %v1254_v7  ;;  %v1151_v62 = vmul.f32 %v2094_v19, %v2724_v49  ;;  %v2096_v17 = vpop.eup %2095  ;;  %2099 = vpow2.f32 %v1868_v15  ;;  %vm1156_vm7 = vweird.f32 %v2094_v19 }
 0x449   :  { %v1235_v24 = vadd.f32 1.0, %v2096_v17  ;;  %v2098_v8 = vpop.eup %2097  ;;  %vm1157_vm11 = vmor %vm1155_vm9, %vm1156_vm7  ;;  %v1143_v49 = vsel %vm2761_vm10, %v2722_v48, %v1139_v21 }
 0x44a   :  { %v1259_v30 = vsel %vm2738_vm4, %v2092_v6, %v1255_v61  ;;  %v1152_v22 = vsub.f32 1.0, %v1151_v62  ;;  %v1283_v51 = vmul.f32 %v2098_v8, %v1249_v16  ;;  %v1148_v39 = vsel %vm1145_vm13, %v1147_v42, %v1143_v49  ;;  %v1383_v49 = vld [vmem:[#allocation2 + $0xd8] sm:$0xff] }
 0x44b   :  { %v1264_v35 = vsel %vm1261_vm5, %v1263_v29, %v1259_v30  ;;  %2101 = vrcp.f32 %v1235_v24  ;;  %v1277_v48 = vand.u32 2147483648, %v1235_v24  ;;  %v1275_v1 = vand.u32 2147483647, %v1235_v24 }
 0x44c   :  { %v1153_v20 = vmul.f32 %v2094_v19, %v1152_v22  ;;  %v1282_v41 = vmul.f32 %v1264_v35, %v2685_v12  ;;  %2103 = vtanh.f32 %v1118_v9  ;;  %vm1271_vm1 = vweird.f32 %v1235_v24 }
 0x44d   :  { %v1278_v27 = vor.u32 1.1754944e-38, %v1277_v48  ;;  %vm1276_vm3 = vcmp.eq.f32.partialorder %v1275_v1, 8.507059e+37 }
 0x44e   :  { %v1154_v44 = vadd.f32 %v2094_v19, %v1153_v20  ;;  %v2100_v45 = vpop.eup %2099  ;;  %v2769_v4 = vadd.f32 %v1283_v51, %v1282_v41 }
 0x44f   :  { %v1134_v12 = vadd.f32 1.0, %v2100_v45 }
 0x450   :  { %v1158_v6 = vsel %vm1157_vm11, %v2094_v19, %v1154_v44 }
 0x451   :  { %v1163_v52 = vsel %vm1160_vm12, %v1162_v47, %v1158_v6  ;;  %v2102_v53 = vpop.eup %2101  ;;  %2105 = vrcp.f32 %v1134_v12  ;;  %v1176_v61 = vand.u32 2147483648, %v1134_v12  ;;  %v1174_v62 = vand.u32 2147483647, %v1134_v12 }
 0x452   :  { %v1267_v54 = vmul.f32 %v2102_v53, %v1235_v24  ;;  %v1181_v57 = vmul.f32 %v1163_v52, %v2698_v55  ;;  %v2104_v59 = vpop.eup %2103  ;;  %2107 = vtanh.f32 %v2769_v4  ;;  %vm1272_vm15 = vweird.f32 %v2102_v53 }
 0x453   :  { %v1182_v36 = vmul.f32 %v2104_v59, %v1148_v39  ;;  %vm1273_vm2 = vmor %vm1271_vm1, %vm1272_vm15  ;;  %vm1170_vm5 = vweird.f32 %v1134_v12  ;;  %v1177_v28 = vor.u32 1.1754944e-38, %v1176_v61  ;;  %vm1175_vm7 = vcmp.eq.f32.partialorder %v1174_v62, 8.507059e+37 }
 0x454   :  { %v1268_v60 = vsub.f32 1.0, %v1267_v54 }
 0x455   :  { %v2773_v7 = vadd.f32 %v1182_v36, %v1181_v57 }
 0x456   :  { %v1269_v63 = vmul.f32 %v2102_v53, %v1268_v60  ;;  %v1382_v60 = vld [vmem:[#allocation2 + $0xd0] sm:$0xff] }
 0x457   :  { %v2106_v3 = vpop.eup %2105  ;;  %2109 = vtanh.f32 %v2773_v7 }
 0x458   :  { %v1166_v14 = vmul.f32 %v2106_v3, %v1134_v12  ;;  %v1270_v50 = vadd.f32 %v2102_v53, %v1269_v63  ;;  %v2108_v55 = vpop.eup %2107  ;;  %vm1171_vm4 = vweird.f32 %v2106_v3 }
 0x459   :  { %vm1172_vm6 = vmor %vm1170_vm5, %vm1171_vm4 }
 0x45a   :  { %v1167_v19 = vsub.f32 1.0, %v1166_v14  ;;  %v1274_v58 = vsel %vm1273_vm2, %v2102_v53, %v1270_v50 }
 0x45b   :  { %v1279_v23 = vsel %vm1276_vm3, %v1278_v27, %v1274_v58 }
 0x45c   :  { %v1286_v15 = vmul.f32 %v2108_v55, %v1279_v23  ;;  %v1168_v25 = vmul.f32 %v2106_v3, %v1167_v19 }
 0x45d   :  { %v2110_v29 = vpop.eup %2109 }
 0x45e   :  { %1399 = vmatpush.msrb.mxu0 %v1286_v15  ;;  %v1169_v26 = vadd.f32 %v2106_v3, %v1168_v25 }
 0x45f   :  { %1883 = vmatmul.msk.f32.vlgmr.msrb.gmra.mxu0 %vm200_vm0, %v2550_v40  ;;  %v1380_v40 = vld [vmem:[#allocation2 + $0xc0] sm:$0xff] }
 0x460   :  { %v1173_v17 = vsel %vm1172_vm6, %v2106_v3, %v1169_v26 }
 0x461   :  { %v1178_v30 = vsel %vm1175_vm7, %v1177_v28, %v1173_v17 }
 0x462   :  { %v1185_v22 = vmul.f32 %v2110_v29, %v1178_v30 }
 0x464   :  { %1301 = vmatpush.msra.mxu3 %v1185_v22 }
 0x466   :  { %1302 = vmatpush.msra.mxu3 %v1286_v15 }
 0x467   :  { %1876 = vmatmul.msk.f32.vlgmr.msra.gmra.mxu3 %vm313_vm14, %v2379_v32  ;;  %1884 = vmatmul.msk.f32.gmra.mxu0 %vm200_vm0, %v2559_v43  ;;  %v1381_v43 = vld [vmem:[#allocation2 + $0xc8] sm:$0xff] }
 0x46f   :  { %1877 = vmatmul.msk.f32.gmra.mxu3 %vm313_vm14, %v2385_v10  ;;  %1885 = vmatmul.msk.f32.gmra.mxu0 %vm200_vm0, %v2568_v5 }
 0x477   :  { %1878 = vmatmul.msk.f32.gmra.mxu3 %vm313_vm14, %v2391_v33  ;;  %1886 = vmatmul.msk.f32.gmra.mxu0 %vm200_vm0, %v2577_v46 }
 0x47f   :  { %1879 = vmatmul.msk.f32.gmra.mxu3 %vm313_vm14, %v2397_v34 }
 0x4dc   :  { %v1401_v9 = vpop.f32.mrf.mxu0 }
 0x4dd   :  { %v1413_v24 = vadd.f32 %v1401_v9, %v1380_v40 }
 0x4df   :  { %v1887_v13 = vmul.f32 -1.442695, %v1413_v24 }
 0x4e1   :  { %2111 = vpow2.f32 %v1887_v13 }
 0x4e4   :  { %v1404_v16 = vpop.f32.mrf.mxu0 }
 0x4e5   :  { %v1414_v35 = vadd.f32 %v1404_v16, %v1381_v43 }
 0x4e7   :  { %v2112_v18 = vpop.eup %2111  ;;  %v1888_v20 = vmul.f32 -1.442695, %v1414_v35 }
 0x4e8   :  { %v1426_v5 = vadd.f32 1.0, %v2112_v18 }
 0x4e9   :  { %2113 = vpow2.f32 %v1888_v20 }
 0x4ea   :  { %2115 = vrcp.f32 %v1426_v5  ;;  %v1304_v21 = vpop.f32.mrf.mxu3  ;;  %v1440_v27 = vand.u32 2147483648, %v1426_v5  ;;  %vm1434_vm10 = vweird.f32 %v1426_v5  ;;  %v1438_v55 = vand.u32 2147483647, %v1426_v5 }
 0x4eb   :  { %v1305_v38 = vadd.f32 %v1304_v21, %v2403_v11 }
 0x4ec   :  { %v1407_v46 = vpop.f32.mrf.mxu0  ;;  %v1441_v29 = vor.u32 1.1754944e-38, %v1440_v27  ;;  %vm1439_vm1 = vcmp.eq.f32.partialorder %v1438_v55, 8.507059e+37 }
 0x4ed   :  { %v1880_v8 = vmul.f32 -1.442695, %v1305_v38  ;;  %v1415_v63 = vadd.f32 %v1407_v46, %v1382_v60 }
 0x4ef   :  { %v2114_v41 = vpop.eup %2113  ;;  %2117 = vpow2.f32 %v1880_v8 }
 0x4f0   :  { %v2116_v31 = vpop.eup %2115  ;;  %v1427_v2 = vadd.f32 1.0, %v2114_v41 }
 0x4f1   :  { %v1430_v44 = vmul.f32 %v2116_v31, %v1426_v5  ;;  %vm1435_vm8 = vweird.f32 %v2116_v31 }
 0x4f2   :  { %2119 = vrcp.f32 %v1427_v2  ;;  %v1307_v45 = vpop.f32.mrf.mxu3  ;;  %v1455_v1 = vand.u32 2147483648, %v1427_v2  ;;  %v1453_v19 = vand.u32 2147483647, %v1427_v2  ;;  %vm1449_vm11 = vweird.f32 %v1427_v2  ;;  %vm2801_vm12 = vmor %vm1434_vm10, %vm1435_vm8 }
 0x4f3   :  { %v1308_v47 = vadd.f32 %v1307_v45, %v2406_v37  ;;  %v1431_v51 = vsub.f32 1.0, %v1430_v44 }
 0x4f4   :  { %v1410_v6 = vpop.f32.mrf.mxu0  ;;  %v1456_v26 = vor.u32 1.1754944e-38, %v1455_v1  ;;  %vm1454_vm15 = vcmp.eq.f32.partialorder %v1453_v19, 8.507059e+37 }
 0x4f5   :  { %v2118_v12 = vpop.eup %2117  ;;  %v1881_v42 = vmul.f32 -1.442695, %v1308_v47  ;;  %v1416_v52 = vadd.f32 %v1410_v6, %v1383_v49  ;;  %v1432_v57 = vmul.f32 %v2116_v31, %v1431_v51 }
 0x4f6   :  { %v2794_v53 = vadd.f32 1.0, %v2118_v12 }
 0x4f7   :  { %2121 = vpow2.f32 %v1881_v42  ;;  %v1889_v39 = vmul.f32 -1.442695, %v1416_v52  ;;  %v1433_v3 = vadd.f32 %v2116_v31, %v1432_v57 }
 0x4f8   :  { %v2120_v54 = vpop.eup %2119  ;;  %2123 = vrcp.f32 %v2794_v53  ;;  %vm1333_vm2 = vweird.f32 %v2794_v53  ;;  %v1339_v49 = vand.u32 2147483648, %v2794_v53 }
 0x4f9   :  { %v1445_v59 = vmul.f32 %v2120_v54, %v1427_v2  ;;  %2125 = vpow2.f32 %v1889_v39  ;;  %vm1450_vm9 = vweird.f32 %v2120_v54  ;;  %v1437_v28 = vsel %vm2801_vm12, %v2116_v31, %v1433_v3 }
 0x4fa   :  { %v1310_v36 = vpop.f32.mrf.mxu3  ;;  %2127 = vtanh.f32 %v1415_v63  ;;  %vm1451_vm13 = vmor %vm1449_vm11, %vm1450_vm9  ;;  %v1442_v24 = vsel %vm1439_vm1, %v1441_v29, %v1437_v28  ;;  %v1337_v31 = vand.u32 2147483647, %v2794_v53  ;;  %v2196_v29 = vld [vmem:[%s2974_s1 + $0x8] sm:$0xff] }
 0x4fb   :  { %v1446_v48 = vsub.f32 1.0, %v1445_v59 }
 0x4fc   :  { %vm1338_vm12 = vcmp.eq.f32.partialorder %v1337_v31, 8.507059e+37 }
 0x4fd   :  { %v2122_v14 = vpop.eup %2121  ;;  %v1447_v50 = vmul.f32 %v2120_v54, %v1446_v48  ;;  %v1340_v48 = vor.u32 1.1754944e-38, %v1339_v49 }
 0x4fe   :  { %v2797_v58 = vpop.eup %2123  ;;  %v1326_v23 = vadd.f32 1.0, %v2122_v14 }
 0x4ff   :  { %v2126_v61 = vpop.eup %2125  ;;  %v1329_v15 = vmul.f32 %v2797_v58, %v2794_v53  ;;  %v1448_v62 = vadd.f32 %v2120_v54, %v1447_v50  ;;  %vm1334_vm3 = vweird.f32 %v2797_v58 }
 0x500   :  { %2129 = vrcp.f32 %v1326_v23  ;;  %v1428_v17 = vadd.f32 1.0, %v2126_v61  ;;  %v2128_v16 = vpop.eup %2127  ;;  %v1354_v2 = vand.u32 2147483648, %v1326_v23  ;;  %v1352_v44 = vand.u32 2147483647, %v1326_v23  ;;  %vm2819_vm6 = vmor %vm1333_vm2, %vm1334_vm3 }
 0x501   :  { %v1452_v30 = vsel %vm1451_vm13, %v2120_v54, %v1448_v62  ;;  %v1330_v9 = vsub.f32 1.0, %v1329_v15  ;;  %v1476_v20 = vmul.f32 %v2128_v16, %v1442_v24  ;;  %vm1348_vm5 = vweird.f32 %v1326_v23  ;;  %v2198_v16 = vld [vmem:[%s2974_s1 + $0x18] sm:$0xff] }
 0x502   :  { %v1457_v22 = vsel %vm1454_vm15, %v1456_v26, %v1452_v30  ;;  %2131 = vrcp.f32 %v1428_v17  ;;  %v1313_v40 = vpop.f32.mrf.mxu3  ;;  %v1470_v6 = vand.u32 2147483648, %v1428_v17  ;;  %v1468_v39 = vand.u32 2147483647, %v1428_v17 }
 0x503   :  { %v1314_v13 = vadd.f32 %v1313_v40, %v2415_v56  ;;  %v1475_v43 = vmul.f32 %v1457_v22, %v2769_v4  ;;  %v1331_v21 = vmul.f32 %v2797_v58, %v1330_v9  ;;  %v1311_v4 = vadd.f32 %v1310_v36, %v2424_v0 }
 0x504   :  { %v1355_v57 = vor.u32 1.1754944e-38, %v1354_v2  ;;  %vm1353_vm9 = vcmp.eq.f32.partialorder %v1352_v44, 8.507059e+37  ;;  %vm1464_vm10 = vweird.f32 %v1428_v17  ;;  %v1471_v1 = vor.u32 1.1754944e-38, %v1470_v6 }
 0x505   :  { %v1882_v35 = vmul.f32 -1.442695, %v1314_v13  ;;  %v2810_v46 = vadd.f32 %v1476_v20, %v1475_v43  ;;  %v1332_v51 = vadd.f32 %v2797_v58, %v1331_v21  ;;  %vm1469_vm13 = vcmp.eq.f32.partialorder %v1468_v39, 8.507059e+37  ;;  %v2197_v43 = vld [vmem:[%s2974_s1 + $0x10] sm:$0xff]  ;;  %v1574_v21 = vld [vmem:[#allocation2 + $0xe8] sm:$0xff] }
 0x506   :  { %v2130_v18 = vpop.eup %2129 }
 0x507   :  { %v1344_v5 = vmul.f32 %v2130_v18, %v1326_v23  ;;  %2133 = vpow2.f32 %v1882_v35  ;;  %vm1349_vm4 = vweird.f32 %v2130_v18  ;;  %v1336_v59 = vsel %vm2819_vm6, %v2797_v58, %v1332_v51  ;;  %v2830_v58 = vld [vmem:[%s2974_s1] sm:$0xff] }
 0x508   :  { %v2132_v38 = vpop.eup %2131  ;;  %2135 = vtanh.f32 %v2810_v46  ;;  %vm1350_vm8 = vmor %vm1348_vm5, %vm1349_vm4  ;;  %v1341_v50 = vsel %vm1338_vm12, %v1340_v48, %v1336_v59  ;;  %1769 = vrot.lane.b32.xlu2 %v2830_v58, %s2204_s21 }
 0x509   :  { %v1345_v8 = vsub.f32 1.0, %v1344_v5  ;;  %v1460_v41 = vmul.f32 %v2132_v38, %v1428_v17  ;;  %vm1465_vm7 = vweird.f32 %v2132_v38  ;;  %2137 = vtanh.f32 %v1311_v4 }
 0x50a   :  { %vm1466_vm11 = vmor %vm1464_vm10, %vm1465_vm7 }
 0x50b   :  { %v1346_v45 = vmul.f32 %v2130_v18, %v1345_v8  ;;  %v1461_v47 = vsub.f32 1.0, %v1460_v41 }
 0x50d   :  { %v1347_v42 = vadd.f32 %v2130_v18, %v1346_v45  ;;  %v1462_v52 = vmul.f32 %v2132_v38, %v1461_v47  ;;  %v2134_v54 = vpop.eup %2133 }
 0x50e   :  { %v1327_v60 = vadd.f32 1.0, %v2134_v54  ;;  %v2136_v14 = vpop.eup %2135  ;;  %v1576_v54 = vld [vmem:[#allocation2 + $0xf8] sm:$0xff] }
 0x50f   :  { %v1351_v53 = vsel %vm1350_vm8, %v2130_v18, %v1347_v42  ;;  %v1463_v36 = vadd.f32 %v2132_v38, %v1462_v52  ;;  %v2138_v23 = vpop.eup %2137  ;;  %v1573_v18 = vld [vmem:[#allocation2 + $0xe0] sm:$0xff] }
 0x510   :  { %v1356_v63 = vsel %vm1353_vm9, %v1355_v57, %v1351_v53  ;;  %2139 = vrcp.f32 %v1327_v60  ;;  %v1375_v61 = vmul.f32 %v2138_v23, %v1341_v50  ;;  %v1367_v17 = vand.u32 2147483647, %v1327_v60 }
 0x511   :  { %v1467_v3 = vsel %vm1466_vm11, %v2132_v38, %v1463_v36  ;;  %v1374_v19 = vmul.f32 %v1356_v63, %v2773_v7  ;;  %v1369_v7 = vand.u32 2147483648, %v1327_v60  ;;  %vm1363_vm1 = vweird.f32 %v1327_v60 }
 0x512   :  { %v1472_v27 = vsel %vm1469_vm13, %v1471_v1, %v1467_v3  ;;  %vm1368_vm3 = vcmp.eq.f32.partialorder %v1367_v17, 8.507059e+37 }
 0x513   :  { %v1479_v55 = vmul.f32 %v2136_v14, %v1472_v27  ;;  %v2834_v25 = vadd.f32 %v1375_v61, %v1374_v19  ;;  %v1370_v22 = vor.u32 1.1754944e-38, %v1369_v7  ;;  %v1575_v19 = vld [vmem:[#allocation2 + $0xf0] sm:$0xff] }
 0x515   :  { %1592 = vmatpush.msrb.mxu2 %v1479_v55  ;;  %2141 = vtanh.f32 %v2834_v25 }
 0x516   :  { %1897 = vmatmul.msk.f32.vlgmr.msrb.gmra.mxu2 %vm200_vm0, %v2830_v58  ;;  %v2140_v15 = vpop.eup %2139 }
 0x517   :  { %v1359_v62 = vmul.f32 %v2140_v15, %v1327_v60  ;;  %vm1364_vm15 = vweird.f32 %v2140_v15 }
 0x518   :  { %vm1365_vm2 = vmor %vm1363_vm1, %vm1364_vm15 }
 0x519   :  { %v1360_v26 = vsub.f32 1.0, %v1359_v62 }
 0x51b   :  { %v1361_v28 = vmul.f32 %v2140_v15, %v1360_v26  ;;  %v2142_v9 = vpop.eup %2141 }
 0x51d   :  { %v1362_v30 = vadd.f32 %v2140_v15, %v1361_v28 }
 0x51e   :  { %1898 = vmatmul.msk.f32.gmra.mxu2 %vm200_vm0, %v2196_v29 }
 0x51f   :  { %v1366_v40 = vsel %vm1365_vm2, %v2140_v15, %v1362_v30 }
 0x520   :  { %v1371_v24 = vsel %vm1368_vm3, %v1370_v22, %v1366_v40 }
 0x521   :  { %v1378_v13 = vmul.f32 %v2142_v9, %v1371_v24 }
 0x523   :  { %1494 = vmatpush.msrb.mxu1 %v1378_v13 }
 0x525   :  { %1495 = vmatpush.msrb.mxu1 %v1479_v55 }
 0x526   :  { %1899 = vmatmul.msk.f32.gmra.mxu2 %vm200_vm0, %v2197_v43  ;;  %1890 = vmatmul.msk.f32.vlgmr.msrb.gmra.mxu1 %vm313_vm14, %v2379_v32 }
 0x52e   :  { %1900 = vmatmul.msk.f32.gmra.mxu2 %vm200_vm0, %v2198_v16  ;;  %1891 = vmatmul.msk.f32.gmra.mxu1 %vm313_vm14, %v2385_v10 }
 0x536   :  { %1892 = vmatmul.msk.f32.gmra.mxu1 %vm313_vm14, %v2391_v33 }
 0x53e   :  { %1893 = vmatmul.msk.f32.gmra.mxu1 %vm313_vm14, %v2397_v34 }
 0x599   :  { %v1594_v35 = vpop.f32.mrf.mxu2 }
 0x59a   :  { %v1606_v20 = vadd.f32 %v1594_v35, %v1573_v18 }
 0x59c   :  { %v1901_v5 = vmul.f32 -1.442695, %v1606_v20 }
 0x59e   :  { %2143 = vpow2.f32 %v1901_v5 }
 0x5a1   :  { %v1597_v38 = vpop.f32.mrf.mxu2 }
 0x5a2   :  { %v1607_v8 = vadd.f32 %v1597_v38, %v1574_v21 }
 0x5a3   :  { %v1497_v31 = vpop.f32.mrf.mxu1 }
 0x5a4   :  { %v1902_v41 = vmul.f32 -1.442695, %v1607_v8  ;;  %v1498_v2 = vadd.f32 %v1497_v31, %v2403_v11  ;;  %v2144_v45 = vpop.eup %2143 }
 0x5a5   :  { %v2859_v49 = vadd.f32 1.0, %v2144_v45 }
 0x5a6   :  { %2145 = vpow2.f32 %v1902_v41  ;;  %v1894_v4 = vmul.f32 -1.442695, %v1498_v2 }
 0x5a7   :  { %v1633_v28 = vand.u32 2147483648, %v2859_v49  ;;  %vm1627_vm4 = vweird.f32 %v2859_v49  ;;  %v1631_v9 = vand.u32 2147483647, %v2859_v49 }
 0x5a8   :  { %2147 = vpow2.f32 %v1894_v4 }
 0x5a9   :  { %v1600_v44 = vpop.f32.mrf.mxu2  ;;  %v1634_v24 = vor.u32 1.1754944e-38, %v1633_v28 }
 0x5aa   :  { %v1608_v23 = vadd.f32 %v1600_v44, %v1575_v19 }
 0x5ab   :  { %v1500_v51 = vpop.f32.mrf.mxu1 }
 0x5ac   :  { %v2146_v47 = vpop.eup %2145  ;;  %v1501_v12 = vadd.f32 %v1500_v51, %v2406_v37 }
 0x5ad   :  { %v2861_v6 = vadd.f32 1.0, %v2146_v47 }
 0x5ae   :  { %v2148_v42 = vpop.eup %2147  ;;  %v1895_v39 = vmul.f32 -1.442695, %v1501_v12 }
 0x5af   :  { %2149 = vrcp.f32 %v2861_v6  ;;  %v2865_v52 = vadd.f32 1.0, %v2148_v42  ;;  %vm1642_vm5 = vweird.f32 %v2861_v6  ;;  %v1648_v16 = vand.u32 2147483648, %v2861_v6 }
 0x5b0   :  { %2151 = vrcp.f32 %v2859_v49  ;;  %v1646_v35 = vand.u32 2147483647, %v2861_v6 }
 0x5b1   :  { %v1603_v57 = vpop.f32.mrf.mxu2  ;;  %2153 = vrcp.f32 %v2865_v52  ;;  %vm1526_vm9 = vweird.f32 %v2865_v52  ;;  %v1530_v41 = vand.u32 2147483647, %v2865_v52  ;;  %v1532_v31 = vand.u32 2147483648, %v2865_v52 }
 0x5b2   :  { %v1609_v59 = vadd.f32 %v1603_v57, %v1576_v54  ;;  %2155 = vpow2.f32 %v1895_v39  ;;  %v1649_v12 = vor.u32 1.1754944e-38, %v1648_v16  ;;  %vm1647_vm1 = vcmp.eq.f32.partialorder %v1646_v35, 8.507059e+37 }
 0x5b3   :  { %v1503_v60 = vpop.f32.mrf.mxu1  ;;  %vm1531_vm3 = vcmp.eq.f32.partialorder %v1530_v41, 8.507059e+37 }
 0x5b4   :  { %v1903_v53 = vmul.f32 -1.442695, %v1609_v59  ;;  %v1504_v18 = vadd.f32 %v1503_v60, %v2424_v0  ;;  %v1533_v60 = vor.u32 1.1754944e-38, %v1532_v31 }
 0x5b5   :  { %v2869_v36 = vpop.eup %2149 }
 0x5b6   :  { %2157 = vpow2.f32 %v1903_v53  ;;  %v2871_v48 = vpop.eup %2151  ;;  %v1638_v3 = vmul.f32 %v2869_v36, %v2861_v6  ;;  %vm1643_vm7 = vweird.f32 %v2869_v36  ;;  %v2205_v6 = vmov 35  }
 0x5b7   :  { %v2873_v63 = vpop.eup %2153  ;;  %v1623_v27 = vmul.f32 %v2871_v48, %v2859_v49  ;;  %vm1628_vm6 = vweird.f32 %v2871_v48  ;;  %vm2912_vm10 = vmor %vm1642_vm5, %vm1643_vm7  ;;  %vm1632_vm5 = vcmp.eq.f32.partialorder %v1631_v9, 8.507059e+37  ;;  %1926 = vset.pattern.permute.xlu0 %v2205_v6 }
 0x5b8   :  { %v2156_v1 = vpop.eup %2155  ;;  %v1522_v14 = vmul.f32 %v2873_v63, %v2865_v52  ;;  %v1639_v15 = vsub.f32 1.0, %v1638_v3  ;;  %vm1527_vm8 = vweird.f32 %v2873_v63  ;;  %vm2931_vm15 = vmor %vm1627_vm4, %vm1628_vm6  ;;  %1766 = vperm.xlu0 %1926, %v2830_v58  }
 0x5b9   :  { %v2879_v50 = vadd.f32 1.0, %v2156_v1  ;;  %v1624_v17 = vsub.f32 1.0, %v1623_v27  ;;  %vm2923_vm13 = vmor %vm1526_vm9, %vm1527_vm8 }
 0x5ba   :  { %v1523_v62 = vsub.f32 1.0, %v1522_v14  ;;  %v1640_v30 = vmul.f32 %v2869_v36, %v1639_v15 }
 0x5bb   :  { %2159 = vrcp.f32 %v2879_v50  ;;  %v1506_v61 = vpop.f32.mrf.mxu1  ;;  %v1625_v13 = vmul.f32 %v2871_v48, %v1624_v17  ;;  %v1547_v8 = vand.u32 2147483648, %v2879_v50  ;;  %v1545_v47 = vand.u32 2147483647, %v2879_v50 }
 0x5bc   :  { %v2158_v55 = vpop.eup %2157  ;;  %v1507_v7 = vadd.f32 %v1506_v61, %v2415_v56  ;;  %v1524_v22 = vmul.f32 %v2873_v63, %v1523_v62  ;;  %v1641_v5 = vadd.f32 %v2869_v36, %v1640_v30  ;;  %vm1541_vm12 = vweird.f32 %v2879_v50 }
 0x5bd   :  { %v2884_v26 = vadd.f32 1.0, %v2158_v55  ;;  %v1626_v44 = vadd.f32 %v2871_v48, %v1625_v13  ;;  %v1548_v53 = vor.u32 1.1754944e-38, %v1547_v8  ;;  %vm1546_vm4 = vcmp.eq.f32.partialorder %v1545_v47, 8.507059e+37 }
 0x5be   :  { %v1896_v29 = vmul.f32 -1.442695, %v1507_v7  ;;  %v1525_v38 = vadd.f32 %v2873_v63, %v1524_v22  ;;  %v1645_v39 = vsel %vm2912_vm10, %v2869_v36, %v1641_v5 }
 0x5bf   :  { %2161 = vrcp.f32 %v2884_v26  ;;  %v1630_v49 = vsel %vm2931_vm15, %v2871_v48, %v1626_v44  ;;  %v1650_v3 = vsel %vm1647_vm1, %v1649_v12, %v1645_v39  ;;  %vm1657_vm7 = vweird.f32 %v2884_v26 }
 0x5c0   :  { %2163 = vtanh.f32 %v1608_v23  ;;  %v1529_v54 = vsel %vm2923_vm13, %v2873_v63, %v1525_v38  ;;  %v1635_v19 = vsel %vm1632_vm5, %v1634_v24, %v1630_v49  ;;  %v1668_v55 = vmul.f32 %v1650_v3, %v2810_v46 }
 0x5c1   :  { %v2160_v40 = vpop.eup %2159  ;;  %2165 = vpow2.f32 %v1896_v29  ;;  %v1534_v36 = vsel %vm1531_vm3, %v1533_v60, %v1529_v54  ;;  %v1663_v46 = vand.u32 2147483648, %v2884_v26 }
 0x5c2   :  { %v1537_v43 = vmul.f32 %v2160_v40, %v2879_v50  ;;  %vm1542_vm11 = vweird.f32 %v2160_v40  ;;  %2167 = vtanh.f32 %v1504_v18 }
 0x5c3   :  { %vm1543_vm2 = vmor %vm1541_vm12, %vm1542_vm11 }
 0x5c4   :  { %v1538_v21 = vsub.f32 1.0, %v1537_v43  ;;  %v1664_v43 = vor.u32 1.1754944e-38, %v1663_v46 }
 0x5c5   :  { %v2901_v20 = vpop.eup %2161 }
 0x5c6   :  { %v2164_v2 = vpop.eup %2163  ;;  %v1539_v45 = vmul.f32 %v2160_v40, %v1538_v21  ;;  %v1653_v42 = vmul.f32 %v2901_v20, %v2884_v26  ;;  %vm1658_vm6 = vweird.f32 %v2901_v20 }
 0x5c7   :  { %v2166_v51 = vpop.eup %2165  ;;  %v1669_v62 = vmul.f32 %v2164_v2, %v1635_v19  ;;  %vm1659_vm9 = vmor %vm1657_vm7, %vm1658_vm6 }
 0x5c8   :  { %v1540_v57 = vadd.f32 %v2160_v40, %v1539_v45  ;;  %v1520_v59 = vadd.f32 1.0, %v2166_v51  ;;  %v1654_v50 = vsub.f32 1.0, %v1653_v42  ;;  %v2168_v27 = vpop.eup %2167 }
 0x5c9   :  { %v1568_v23 = vmul.f32 %v2168_v27, %v1534_v36  ;;  %v1670_v28 = vadd.f32 %v1669_v62, %v1668_v55 }
 0x5ca   :  { %v1544_v1 = vsel %vm1543_vm2, %v2160_v40, %v1540_v57  ;;  %2169 = vrcp.f32 %v1520_v59  ;;  %v1655_v61 = vmul.f32 %v2901_v20, %v1654_v50  ;;  %v1560_v22 = vand.u32 2147483647, %v1520_v59 }
 0x5cb   :  { %v1549_v14 = vsel %vm1546_vm4, %v1548_v53, %v1544_v1  ;;  %v1661_v40 = vand.u32 2147483647, %v2884_v26  ;;  %vm1556_vm10 = vweird.f32 %v1520_v59 }
 0x5cc   :  { %v1567_v63 = vmul.f32 %v1549_v14, %v2834_v25  ;;  %v1656_v29 = vadd.f32 %v2901_v20, %v1655_v61  ;;  %v1562_v25 = vand.u32 2147483648, %v1520_v59  ;;  %vm1561_vm12 = vcmp.eq.f32.partialorder %v1560_v22, 8.507059e+37 }
 0x5cd   :  { %vm1662_vm13 = vcmp.eq.f32.partialorder %v1661_v40, 8.507059e+37 }
 0x5ce   :  { %v2947_v48 = vadd.f32 %v1568_v23, %v1567_v63  ;;  %v1660_v24 = vsel %vm1659_vm9, %v2901_v20, %v1656_v29  ;;  %v1563_v13 = vor.u32 1.1754944e-38, %v1562_v25 }
 0x5cf   :  { %v1665_v5 = vsel %vm1662_vm13, %v1664_v43, %v1660_v24  ;;  %v1770_v24 = vpop.permute.xlu2 %1769 }
 0x5d0   :  { %v2170_v15 = vpop.eup %2169  ;;  %2171 = vtanh.f32 %v2947_v48 }
 0x5d1   :  { %v1552_v7 = vmul.f32 %v2170_v15, %v1520_v59  ;;  %vm1557_vm8 = vweird.f32 %v2170_v15  ;;  %2173 = vtanh.f32 %v1670_v28 }
 0x5d2   :  { %vm1558_vm11 = vmor %vm1556_vm10, %vm1557_vm8 }
 0x5d3   :  { %v1553_v17 = vsub.f32 1.0, %v1552_v7 }
 0x5d5   :  { %v1554_v30 = vmul.f32 %v2170_v15, %v1553_v17 }
 0x5d6   :  { %v2172_v35 = vpop.eup %2171 }
 0x5d7   :  { %v1555_v9 = vadd.f32 %v2170_v15, %v1554_v30  ;;  %v2174_v38 = vpop.eup %2173 }
 0x5d8   :  { %v1672_v8 = vmul.f32 %v2174_v38, %v1665_v5 }
 0x5d9   :  { %v1559_v16 = vsel %vm1558_vm11, %v2170_v15, %v1555_v9  ;;  %vm1793_vm11 = vcmask 27648  }
 0x5da   :  { %v1564_v18 = vsel %vm1561_vm12, %v1563_v13, %v1559_v16 }
 0x5db   :  { %v1571_v21 = vmul.f32 %v2172_v35, %v1564_v18 }
 0x5dd   :  { %1687 = vmatpush.msrb.mxu3 %v1571_v21 }
 0x5df   :  { %1688 = vmatpush.msrb.mxu3 %v1672_v8 }
 0x5e0   :  { %1904 = vmatmul.msk.f32.vlgmr.msrb.gmra.mxu3 %vm313_vm14, %v2379_v32 }
 0x5e8   :  { %1905 = vmatmul.msk.f32.gmra.mxu3 %vm313_vm14, %v2385_v10 }
 0x5f0   :  { %1906 = vmatmul.msk.f32.gmra.mxu3 %vm313_vm14, %v2391_v33 }
 0x5f8   :  { %1907 = vmatmul.msk.f32.gmra.mxu3 %vm313_vm14, %v2397_v34 }
 0x62a   :  { %v1767_v13 = vpop.permute.xlu0 %1766 }
 0x663   :  { %v1690_v26 = vpop.f32.mrf.mxu3 }
 0x664   :  { %v1691_v20 = vadd.f32 %v1690_v26, %v2403_v11 }
 0x666   :  { %v1908_v41 = vmul.f32 -1.442695, %v1691_v20 }
 0x668   :  { %2175 = vpow2.f32 %v1908_v41 }
 0x66b   :  { %v1693_v31 = vpop.f32.mrf.mxu3 }
 0x66c   :  { %v1694_v2 = vadd.f32 %v1693_v31, %v2406_v37 }
 0x66e   :  { %v2176_v4 = vpop.eup %2175  ;;  %v1909_v44 = vmul.f32 -1.442695, %v1694_v2 }
 0x66f   :  { %v1711_v32 = vadd.f32 1.0, %v2176_v4 }
 0x670   :  { %2177 = vpow2.f32 %v1909_v44 }
 0x671   :  { %2179 = vrcp.f32 %v1711_v32  ;;  %v1725_v49 = vand.u32 2147483648, %v1711_v32  ;;  %vm1719_vm1 = vweird.f32 %v1711_v32 }
 0x673   :  { %v1696_v10 = vpop.f32.mrf.mxu3  ;;  %v1726_v63 = vor.u32 1.1754944e-38, %v1725_v49 }
 0x674   :  { %v1697_v57 = vadd.f32 %v1696_v10, %v2424_v0 }
 0x676   :  { %v2178_v45 = vpop.eup %2177 }
 0x677   :  { %v2180_v47 = vpop.eup %2179  ;;  %v1712_v33 = vadd.f32 1.0, %v2178_v45 }
 0x678   :  { %v1715_v51 = vmul.f32 %v2180_v47, %v1711_v32  ;;  %vm1720_vm14 = vweird.f32 %v2180_v47 }
 0x679   :  { %2181 = vrcp.f32 %v1712_v33  ;;  %v1740_v59 = vand.u32 2147483648, %v1712_v33  ;;  %v1738_v1 = vand.u32 2147483647, %v1712_v33  ;;  %vm1734_vm2 = vweird.f32 %v1712_v33  ;;  %vm1721_vm3 = vmor %vm1719_vm1, %vm1720_vm14 }
 0x67a   :  { %v1716_v34 = vsub.f32 1.0, %v1715_v51 }
 0x67b   :  { %v1699_v12 = vpop.f32.mrf.mxu3  ;;  %v1741_v58 = vor.u32 1.1754944e-38, %v1740_v59  ;;  %vm1739_vm5 = vcmp.eq.f32.partialorder %v1738_v1, 8.507059e+37 }
 0x67c   :  { %v1700_v11 = vadd.f32 %v1699_v12, %v2415_v56  ;;  %v1717_v37 = vmul.f32 %v2180_v47, %v1716_v34  ;;  %v1723_v56 = vand.u32 2147483647, %v1711_v32 }
 0x67e   :  { %v1910_v42 = vmul.f32 -1.442695, %v1700_v11  ;;  %v1718_v53 = vadd.f32 %v2180_v47, %v1717_v37  ;;  %vm1724_vm6 = vcmp.eq.f32.partialorder %v1723_v56, 8.507059e+37 }
 0x67f   :  { %v2182_v52 = vpop.eup %2181 }
 0x680   :  { %v1730_v39 = vmul.f32 %v2182_v52, %v1712_v33  ;;  %2183 = vpow2.f32 %v1910_v42  ;;  %vm1735_vm15 = vweird.f32 %v2182_v52  ;;  %v1722_v14 = vsel %vm1721_vm3, %v2180_v47, %v1718_v53 }
 0x681   :  { %2185 = vtanh.f32 %v1697_v57  ;;  %vm1736_vm4 = vmor %vm1734_vm2, %vm1735_vm15  ;;  %v1727_v19 = vsel %vm1724_vm6, %v1726_v63, %v1722_v14 }
 0x682   :  { %v1731_v54 = vsub.f32 1.0, %v1730_v39 }
 0x684   :  { %v1732_v60 = vmul.f32 %v2182_v52, %v1731_v54 }
 0x686   :  { %v2184_v3 = vpop.eup %2183  ;;  %v1733_v36 = vadd.f32 %v2182_v52, %v1732_v60 }
 0x687   :  { %v1713_v50 = vadd.f32 1.0, %v2184_v3  ;;  %v2186_v23 = vpop.eup %2185 }
 0x688   :  { %v1737_v0 = vsel %vm1736_vm4, %v2182_v52, %v1733_v36  ;;  %v1761_v61 = vmul.f32 %v2186_v23, %v1727_v19 }
 0x689   :  { %v1742_v27 = vsel %vm1739_vm5, %v1741_v58, %v1737_v0  ;;  %2187 = vrcp.f32 %v1713_v50  ;;  %v1755_v17 = vand.u32 2147483648, %v1713_v50  ;;  %v1753_v25 = vand.u32 2147483647, %v1713_v50 }
 0x68a   :  { %v1760_v55 = vmul.f32 %v1742_v27, %v2947_v48  ;;  %vm1749_vm8 = vweird.f32 %v1713_v50 }
 0x68b   :  { %v1756_v30 = vor.u32 1.1754944e-38, %v1755_v17  ;;  %vm1754_vm10 = vcmp.eq.f32.partialorder %v1753_v25, 8.507059e+37 }
 0x68c   :  { %v1762_v62 = vadd.f32 %v1761_v61, %v1760_v55 }
 0x68e   :  { %2189 = vtanh.f32 %v1762_v62 }
 0x68f   :  { %v2188_v15 = vpop.eup %2187 }
 0x690   :  { %v1745_v7 = vmul.f32 %v2188_v15, %v1713_v50  ;;  %vm1750_vm7 = vweird.f32 %v2188_v15 }
 0x691   :  { %vm1751_vm9 = vmor %vm1749_vm8, %vm1750_vm7 }
 0x692   :  { %v1746_v28 = vsub.f32 1.0, %v1745_v7 }
 0x694   :  { %v1747_v29 = vmul.f32 %v2188_v15, %v1746_v28  ;;  %v2190_v40 = vpop.eup %2189 }
 0x696   :  { %v1748_v46 = vadd.f32 %v2188_v15, %v1747_v29 }
 0x698   :  { %v1752_v22 = vsel %vm1751_vm9, %v2188_v15, %v1748_v46 }
 0x699   :  { %v1757_v9 = vsel %vm1754_vm10, %v1756_v30, %v1752_v22 }
 0x69a   :  { %v1764_v48 = vmul.f32 %v2190_v40, %v1757_v9 }
 0x69c   :  { %1788 = vmatpush.msra.mxu0 %v1764_v48 }
 0x69d   :  { %1911 = vmatmul.msk.f32.vlgmr.msra.gmra.mxu0 %vm200_vm0, %v1770_v24 }
 0x71a   :  { %v1790_v43 = vpop.f32.mrf.mxu0 }
 0x71b   :  { %v1791_v16 = vadd.f32 %v1790_v43, %v1767_v13 }
 0x71d   :  { %1794 = vst.msk [vmem:[%s2976_s2] sm:$0xf] %vm1793_vm11, %v1791_v16 }

</bundles_post_ra>
